<compile_context>
chip_gen: v5e
topology: v5e:2x2
jax: 0.10.0
libtpu: 0.0.40
codegen_flags: <defaults>
</compile_context>

<pallas_src>
import functools

import jax
import jax.numpy as jnp
from jax.experimental import pallas as pl
from jax.experimental.pallas import tpu as pltpu

IN_DIM = 28 * 28      # 784
H1 = 500
H1_PAD = 512          # 500 padded to a multiple of 128 (zero-padded -> exact)
H2 = 256
OUT_DIM = 10
OUT_PAD = 128         # lane-dense output block; extra logits biased to -1e30
TILE_B_MAX = 1024     # batch tile per grid step
NEG_BIG = -1e30       # padded-logit bias: ignored by max, exp() underflows to 0


def _round_up(x, m):
    return ((x + m - 1) // m) * m


def mlp_kernel(x_ref, w1_ref, b1_ref, w2_ref, b2_ref, w3_ref, b3_ref, o_ref):
    # x block arrives f32; cast to bf16 in-kernel (avoids a separate wrapper
    # HBM pass). All matmuls accumulate in f32 on the MXU; bias-add / ReLU /
    # log_softmax epilogue stays f32 on the VPU/EUP.
    x = x_ref[...].astype(jnp.bfloat16)

    h1 = jnp.dot(x, w1_ref[...], preferred_element_type=jnp.float32)
    h1 = jnp.maximum(h1 + b1_ref[...], 0.0)                      # (tile_b, 512)

    h2 = jnp.dot(h1.astype(jnp.bfloat16), w2_ref[...],
                 preferred_element_type=jnp.float32)
    h2 = jnp.maximum(h2 + b2_ref[...], 0.0)                      # (tile_b, 256)

    logits = jnp.dot(h2.astype(jnp.bfloat16), w3_ref[...],
                     preferred_element_type=jnp.float32)
    logits = logits + b3_ref[...]                                # (tile_b, 128)

    # log_softmax over dim=1. Padded lanes carry logit ~ -1e30: they never win
    # the max and contribute exactly 0 to the exp-sum, so the first 10 lanes
    # are identical to the unpadded computation.
    m = jnp.max(logits, axis=1, keepdims=True)
    shifted = logits - m
    lse = jnp.log(jnp.sum(jnp.exp(shifted), axis=1, keepdims=True))
    o_ref[...] = shifted - lse


def prepare_params(params):
    """One-time weight prep (call once, outside the forward pass).

    Pads hidden 500->512 with zeros (exact: padded ReLU outputs are 0 and the
    corresponding w2 rows are 0), pads output 10->128 with zero weights and
    -1e30 biases (exact under log_softmax), and casts weights to bf16
    (biases stay f32).
    """
    w1, b1, w2, b2, w3, b3 = params
    w1p = jnp.zeros((IN_DIM, H1_PAD), jnp.float32).at[:, :H1].set(w1)
    b1p = jnp.zeros((1, H1_PAD), jnp.float32).at[:, :H1].set(b1.reshape(1, H1))
    w2p = jnp.zeros((H1_PAD, H2), jnp.float32).at[:H1, :].set(w2)
    w3p = jnp.zeros((H2, OUT_PAD), jnp.float32).at[:, :OUT_DIM].set(w3)
    b3p = jnp.full((1, OUT_PAD), NEG_BIG, jnp.float32)
    b3p = b3p.at[:, :OUT_DIM].set(b3.reshape(1, OUT_DIM))
    return (
        w1p.astype(jnp.bfloat16), b1p,
        w2p.astype(jnp.bfloat16), b2.reshape(1, H2).astype(jnp.float32),
        w3p.astype(jnp.bfloat16), b3p,
    )


@jax.jit
def net_forward(x_nchw, prepared_params):
    w1, b1, w2, b2, w3, b3 = prepared_params

    B = x_nchw.shape[0]
    x = x_nchw.reshape(B, IN_DIM)                     # torch .view(-1, 784), f32

    # Batch tile: big enough to amortize the ~0.35 us per-step overhead, but
    # capped so the grid has >= 2 steps when possible (v7x megacore shards the
    # "parallel" axis across its 2 TensorCores).
    tile_b = min(TILE_B_MAX, _round_up(max((B + 1) // 2, 1), 8))
    b_pad = _round_up(B, tile_b)
    if b_pad != B:
        x = jnp.pad(x, ((0, b_pad - B), (0, 0)))

    grid = (b_pad // tile_b,)
    bcast = lambda i: (0, 0)                          # weights: same block every step

    flops = 2 * b_pad * (IN_DIM * H1_PAD + H1_PAD * H2 + H2 * OUT_PAD)
    bytes_accessed = (
        x.size * 4                                    # f32 activations in
        + (w1.size + w2.size + w3.size) * 2           # bf16 weights
        + (b1.size + b2.size + b3.size) * 4           # f32 biases
        + b_pad * OUT_PAD * 4                         # f32 output
    )

    out = pl.pallas_call(
        mlp_kernel,
        out_shape=jax.ShapeDtypeStruct((b_pad, OUT_PAD), jnp.float32),
        grid=grid,
        in_specs=[
            pl.BlockSpec((tile_b, IN_DIM), lambda i: (i, 0)),
            pl.BlockSpec((IN_DIM, H1_PAD), bcast),
            pl.BlockSpec((1, H1_PAD), bcast),
            pl.BlockSpec((H1_PAD, H2), bcast),
            pl.BlockSpec((1, H2), bcast),
            pl.BlockSpec((H2, OUT_PAD), bcast),
            pl.BlockSpec((1, OUT_PAD), bcast),
        ],
        out_specs=pl.BlockSpec((tile_b, OUT_PAD), lambda i: (i, 0)),
        compiler_params=pltpu.CompilerParams(
            dimension_semantics=("parallel",),
            vmem_limit_bytes=32 << 20,
        ),
        cost_estimate=pl.CostEstimate(
            flops=flops,
            transcendentals=b_pad * OUT_PAD,
            bytes_accessed=bytes_accessed,
        ),
    )(x, w1, b1, w2, b2, w3, b3)

    return out[:B, :OUT_DIM]


def init_params(key):
    # Deterministic init mirroring torch.nn.Linear default:
    # U(-1/sqrt(fan_in), 1/sqrt(fan_in)) for both weight and bias.
    # Weights stored as (in_features, out_features) for y = x @ W + b.
    def linear(key, fan_in, fan_out):
        kw, kb = jax.random.split(key)
        bound = 1.0 / jnp.sqrt(jnp.float32(fan_in))
        w = jax.random.uniform(kw, (fan_in, fan_out), jnp.float32, -bound, bound)
        b = jax.random.uniform(kb, (fan_out,), jnp.float32, -bound, bound)
        return w, b

    k1, k2, k3 = jax.random.split(key, 3)
    w1, b1 = linear(k1, IN_DIM, H1)
    w2, b2 = linear(k2, H1, H2)
    w3, b3 = linear(k3, H2, OUT_DIM)
    return (w1, b1, w2, b2, w3, b3)


def reference_forward(x_nchw, params):
    # Pure-JAX f32 reference for correctness check.
    w1, b1, w2, b2, w3, b3 = params
    x = x_nchw.reshape(x_nchw.shape[0], IN_DIM).astype(jnp.float32)
    h1 = jax.nn.relu(x @ w1 + b1)
    h2 = jax.nn.relu(h1 @ w2 + b2)
    logits = h2 @ w3 + b3
    return jax.nn.log_softmax(logits, axis=1)


if __name__ == "__main__":
    key = jax.random.PRNGKey(0)
    kx, kp = jax.random.split(key)

    B = 8
    x = jax.random.normal(kx, (B, 1, 28, 28), jnp.float32)   # NCHW input
    params = init_params(kp)

    # Weight prep happens once, outside the per-call forward.
    prepared = jax.block_until_ready(prepare_params(params))

    out = net_forward(x, prepared)
    out = jax.block_until_ready(out)

    ref = reference_forward(x, params)
    assert out.shape == (B, 10)
    # bf16 matmuls (f32 accumulation) vs f32 reference -> modest tolerance.
    assert jnp.allclose(out, ref, atol=3e-2, rtol=3e-2), "mismatch vs reference"

    print("KERNEL_OK")
</pallas_src>

<mosaic_0001>
module attributes {stable_mosaic.version = 11 : i64} {
  func.func @mlp_kernel(%arg0: i32, %arg1: memref<8x784xf32, #tpu.memory_space<vmem>>, %arg2: memref<784x512xbf16, #tpu.memory_space<vmem>>, %arg3: memref<1x512xf32, #tpu.memory_space<vmem>>, %arg4: memref<512x256xbf16, #tpu.memory_space<vmem>>, %arg5: memref<1x256xf32, #tpu.memory_space<vmem>>, %arg6: memref<256x128xbf16, #tpu.memory_space<vmem>>, %arg7: memref<1x128xf32, #tpu.memory_space<vmem>>, %arg8: memref<8x128xf32, #tpu.memory_space<vmem>>) attributes {dimension_semantics = [#tpu.dimension_semantics<parallel>], iteration_bounds = array<i64: 1>, scalar_prefetch = 0 : i64, scratch_operands = 0 : i64, tpu.core_type = #tpu.core_type<tc>, window_params = [{transform_indices = @transform_0, window_bounds = array<i64: 8, 784>}, {pipeline_mode = #tpu.pipeline_mode<synchronous>, transform_indices = @transform_1, window_bounds = array<i64: 784, 512>}, {pipeline_mode = #tpu.pipeline_mode<synchronous>, transform_indices = @transform_2, window_bounds = array<i64: 1, 512>}, {pipeline_mode = #tpu.pipeline_mode<synchronous>, transform_indices = @transform_3, window_bounds = array<i64: 512, 256>}, {pipeline_mode = #tpu.pipeline_mode<synchronous>, transform_indices = @transform_4, window_bounds = array<i64: 1, 256>}, {pipeline_mode = #tpu.pipeline_mode<synchronous>, transform_indices = @transform_5, window_bounds = array<i64: 256, 128>}, {pipeline_mode = #tpu.pipeline_mode<synchronous>, transform_indices = @transform_6, window_bounds = array<i64: 1, 128>}, {transform_indices = @transform_7, window_bounds = array<i64: 8, 128>}]} {
    %c0 = arith.constant 0 : index
    %c0_0 = arith.constant 0 : index
    %0 = vector.load %arg1[%c0, %c0_0] : memref<8x784xf32, #tpu.memory_space<vmem>>, vector<8x784xf32>
    %1 = arith.truncf %0 : vector<8x784xf32> to vector<8x784xbf16>
    %c0_1 = arith.constant 0 : index
    %c0_2 = arith.constant 0 : index
    %2 = vector.load %arg2[%c0_1, %c0_2] : memref<784x512xbf16, #tpu.memory_space<vmem>>, vector<784x512xbf16>
    %cst = arith.constant dense<0.000000e+00> : vector<8x512xf32>
    %3 = tpu.matmul %1, %2, %cst {dimension_numbers = #tpu.dot_dimension_numbers<[1], [0], [0], [1], [0, 0, 1, 1], [], []>} : vector<8x784xbf16>, vector<784x512xbf16>, vector<8x512xf32> -> vector<8x512xf32>
    %c0_3 = arith.constant 0 : index
    %c0_4 = arith.constant 0 : index
    %4 = vector.load %arg3[%c0_3, %c0_4] : memref<1x512xf32, #tpu.memory_space<vmem>>, vector<1x512xf32>
    %5 = vector.broadcast %4 : vector<1x512xf32> to vector<8x512xf32>
    %6 = arith.addf %3, %5 : vector<8x512xf32>
    %cst_5 = arith.constant 0.000000e+00 : f32
    %7 = vector.broadcast %cst_5 : f32 to vector<8x512xf32>
    %8 = arith.maximumf %6, %7 : vector<8x512xf32>
    %9 = arith.truncf %8 : vector<8x512xf32> to vector<8x512xbf16>
    %c0_6 = arith.constant 0 : index
    %c0_7 = arith.constant 0 : index
    %10 = vector.load %arg4[%c0_6, %c0_7] : memref<512x256xbf16, #tpu.memory_space<vmem>>, vector<512x256xbf16>
    %cst_8 = arith.constant dense<0.000000e+00> : vector<8x256xf32>
    %11 = tpu.matmul %9, %10, %cst_8 {dimension_numbers = #tpu.dot_dimension_numbers<[1], [0], [0], [1], [0, 0, 1, 1], [], []>} : vector<8x512xbf16>, vector<512x256xbf16>, vector<8x256xf32> -> vector<8x256xf32>
    %c0_9 = arith.constant 0 : index
    %c0_10 = arith.constant 0 : index
    %12 = vector.load %arg5[%c0_9, %c0_10] : memref<1x256xf32, #tpu.memory_space<vmem>>, vector<1x256xf32>
    %13 = vector.broadcast %12 : vector<1x256xf32> to vector<8x256xf32>
    %14 = arith.addf %11, %13 : vector<8x256xf32>
    %cst_11 = arith.constant 0.000000e+00 : f32
    %15 = vector.broadcast %cst_11 : f32 to vector<8x256xf32>
    %16 = arith.maximumf %14, %15 : vector<8x256xf32>
    %17 = arith.truncf %16 : vector<8x256xf32> to vector<8x256xbf16>
    %c0_12 = arith.constant 0 : index
    %c0_13 = arith.constant 0 : index
    %18 = vector.load %arg6[%c0_12, %c0_13] : memref<256x128xbf16, #tpu.memory_space<vmem>>, vector<256x128xbf16>
    %cst_14 = arith.constant dense<0.000000e+00> : vector<8x128xf32>
    %19 = tpu.matmul %17, %18, %cst_14 {dimension_numbers = #tpu.dot_dimension_numbers<[1], [0], [0], [1], [0, 0, 1, 1], [], []>} : vector<8x256xbf16>, vector<256x128xbf16>, vector<8x128xf32> -> vector<8x128xf32>
    %c0_15 = arith.constant 0 : index
    %c0_16 = arith.constant 0 : index
    %20 = vector.load %arg7[%c0_15, %c0_16] : memref<1x128xf32, #tpu.memory_space<vmem>>, vector<1x128xf32>
    %21 = vector.broadcast %20 : vector<1x128xf32> to vector<8x128xf32>
    %22 = arith.addf %19, %21 : vector<8x128xf32>
    %cst_17 = arith.constant dense<0xFF800000> : vector<8xf32>
    %23 = vector.multi_reduction <maximumf>, %22, %cst_17 [1] : vector<8x128xf32> to vector<8xf32>
    %24 = vector.shape_cast %23 : vector<8xf32> to vector<8x1xf32>
    %25 = vector.broadcast %24 : vector<8x1xf32> to vector<8x128xf32>
    %26 = arith.subf %22, %25 : vector<8x128xf32>
    %27 = math.exp %26 : vector<8x128xf32>
    %cst_18 = arith.constant dense<0.000000e+00> : vector<8xf32>
    %28 = vector.multi_reduction <add>, %27, %cst_18 [1] : vector<8x128xf32> to vector<8xf32>
    %29 = vector.shape_cast %28 : vector<8xf32> to vector<8x1xf32>
    %30 = math.log %29 : vector<8x1xf32>
    %31 = vector.broadcast %30 : vector<8x1xf32> to vector<8x128xf32>
    %32 = arith.subf %26, %31 : vector<8x128xf32>
    %c0_19 = arith.constant 0 : index
    %c0_20 = arith.constant 0 : index
    %33 = vector.load %arg8[%c0_19, %c0_20] : memref<8x128xf32, #tpu.memory_space<vmem>>, vector<8x128xf32>
    tpu.vector_store %arg8[%c0_19, %c0_20], %32 {strides = array<i32>} : memref<8x128xf32, #tpu.memory_space<vmem>>, vector<8x128xf32>,
    return
  }
  func.func @transform_0(%arg0: i32) -> (i32, i32) {
    %c0_i32 = arith.constant 0 : i32
    %c0_i32_0 = arith.constant 0 : i32
    return %arg0, %c0_i32 : i32, i32
  }
  func.func @transform_1(%arg0: i32) -> (i32, i32) {
    %c0_i32 = arith.constant 0 : i32
    %c0_i32_0 = arith.constant 0 : i32
    %c0_i32_1 = arith.constant 0 : i32
    return %c0_i32, %c0_i32_0 : i32, i32
  }
  func.func @transform_2(%arg0: i32) -> (i32, i32) {
    %c0_i32 = arith.constant 0 : i32
    %c0_i32_0 = arith.constant 0 : i32
    %c0_i32_1 = arith.constant 0 : i32
    return %c0_i32, %c0_i32_0 : i32, i32
  }
  func.func @transform_3(%arg0: i32) -> (i32, i32) {
    %c0_i32 = arith.constant 0 : i32
    %c0_i32_0 = arith.constant 0 : i32
    %c0_i32_1 = arith.constant 0 : i32
    return %c0_i32, %c0_i32_0 : i32, i32
  }
  func.func @transform_4(%arg0: i32) -> (i32, i32) {
    %c0_i32 = arith.constant 0 : i32
    %c0_i32_0 = arith.constant 0 : i32
    %c0_i32_1 = arith.constant 0 : i32
    return %c0_i32, %c0_i32_0 : i32, i32
  }
  func.func @transform_5(%arg0: i32) -> (i32, i32) {
    %c0_i32 = arith.constant 0 : i32
    %c0_i32_0 = arith.constant 0 : i32
    %c0_i32_1 = arith.constant 0 : i32
    return %c0_i32, %c0_i32_0 : i32, i32
  }
  func.func @transform_6(%arg0: i32) -> (i32, i32) {
    %c0_i32 = arith.constant 0 : i32
    %c0_i32_0 = arith.constant 0 : i32
    %c0_i32_1 = arith.constant 0 : i32
    return %c0_i32, %c0_i32_0 : i32, i32
  }
  func.func @transform_7(%arg0: i32) -> (i32, i32) {
    %c0_i32 = arith.constant 0 : i32
    %c0_i32_0 = arith.constant 0 : i32
    return %arg0, %c0_i32 : i32, i32
  }
}

</mosaic_0001>

<bundles_post_ra>
// kernel: net_forward.1
= control target key start
LH: loop header
LB: loop body
LE: loop exit
PB: predicated region body
PF: predicated region fallthrough
CT: control target
= control target key end

     0   :  { %12 = vsyncpa [#allocation3], 0  ;;  %s4329_s0 = inlined_call_operand.vmem [shape: f32[8,784], index: 0, kind: input, shape index: {}]   ;;  %s4330_s1 = inlined_call_operand.hbm [shape: bf16[784,512], index: 1, kind: input, shape index: {}]   ;;  %s4331_s2 = inlined_call_operand.vmem [shape: f32[1,512], index: 2, kind: input, shape index: {}]   ;;  %s4332_s3 = inlined_call_operand.vmem [shape: bf16[512,256], index: 3, kind: input, shape index: {}]   ;;  %s4333_s4 = inlined_call_operand.vmem [shape: f32[1,256], index: 4, kind: input, shape index: {}]   ;;  %s4334_s5 = inlined_call_operand.vmem [shape: bf16[256,128], index: 5, kind: input, shape index: {}]   ;;  %s4335_s6 = inlined_call_operand.vmem [shape: f32[1,128], index: 6, kind: input, shape index: {}]   ;;  %s4336_s7 = inlined_call_operand.hbm [shape: f32[8,128], index: 7, kind: output, shape index: {}]  }
   0x1   :  { %13 = vsyncpa [#allocation4], 0  ;;  %s20_s26 = sshll.u32 %s4330_s1, 4  ;;  %s3749_s27 = smov [#allocation2]   ;;  %s21_s26 = int_to_ptr.hbm [resolvable:$true] %s20_s26 }
   0x2   :  { %s22_s28 = sshll.u32 %s3749_s27, 4  ;;  %s3750_s29 = smov 256   ;;  %s23_s28 = int_to_ptr.vmem [resolvable:$true] %s22_s28 }
   0x3   :  { %s3751_s30 = smov 16  }
   0x4   :  { %28 = dma.hbm_to_vmem [thread:$0]  %s21_s26, 25088, %s23_s28, [#allocation3], %s3750_s29, %s3750_s29, %s3751_s30  }
   0x5   :  { %3745 = dma.done.wait [#allocation3], 25088  }
   0x6   :  { %3746 = vsyncadd [#allocation3], 4294942208  ;;  %v2418_v0 = vld [vmem:[#allocation2 + $0xe0] sm:$0xf]  ;;  %v3442_v1 = vld [vmem:[#allocation2 + $0xec] sm:$0xf0] }
   0x7   :  { %v2546_v2 = vld [vmem:[#allocation2 + $0x1e0] sm:$0xf]  ;;  %v2419_v3 = vor.u32 %v3442_v1, %v2418_v0  ;;  %v3474_v4 = vld [vmem:[#allocation2 + $0x1ec] sm:$0xf0]  ;;  %vm1244_vm0 = vcmask 130048  }
   0x8   :  { %v2674_v5 = vld [vmem:[#allocation2 + $0x2e0] sm:$0xf]  ;;  %v3506_v6 = vld [vmem:[#allocation2 + $0x2ec] sm:$0xf0]  ;;  %v2547_v7 = vor.u32 %v3474_v4, %v2546_v2 }
   0x9   :  { %v2675_v8 = vor.u32 %v3506_v6, %v2674_v5  ;;  %v2802_v9 = vld [vmem:[#allocation2 + $0x3e0] sm:$0xf]  ;;  %v3538_v10 = vld [vmem:[#allocation2 + $0x3ec] sm:$0xf0]  ;;  %1248 = vmatpush.bf16.msra.mxu0 %v2419_v3 }
   0xa   :  { %v2402_v11 = vld [vmem:[#allocation2 + $0xc0] sm:$0xf]  ;;  %v2803_v12 = vor.u32 %v3538_v10, %v2802_v9  ;;  %v3438_v13 = vld [vmem:[#allocation2 + $0xcc] sm:$0xf0]  ;;  %1261 = vmatpush.bf16.msra.mxu1 %v2547_v7 }
   0xb   :  { %v2530_v14 = vld [vmem:[#allocation2 + $0x1c0] sm:$0xf]  ;;  %v3470_v15 = vld [vmem:[#allocation2 + $0x1cc] sm:$0xf0]  ;;  %1274 = vmatpush.bf16.msra.mxu2 %v2675_v8  ;;  %v2403_v16 = vor.u32 %v3438_v13, %v2402_v11 }
   0xc   :  { %v2531_v17 = vor.u32 %v3470_v15, %v2530_v14  ;;  %v2658_v18 = vld [vmem:[#allocation2 + $0x2c0] sm:$0xf]  ;;  %v3502_v19 = vld [vmem:[#allocation2 + $0x2cc] sm:$0xf0]  ;;  %1287 = vmatpush.bf16.msra.mxu3 %v2803_v12 }
   0xd   :  { %v2786_v20 = vld [vmem:[#allocation2 + $0x3c0] sm:$0xf]  ;;  %v2659_v21 = vor.u32 %v3502_v19, %v2658_v18  ;;  %v3534_v22 = vld [vmem:[#allocation2 + $0x3cc] sm:$0xf0]  ;;  %1249 = vmatpush.bf16.msra.mxu0 %v2403_v16 }
   0xe   :  { %v2386_v23 = vld [vmem:[#allocation2 + $0xa0] sm:$0xf]  ;;  %v3434_v24 = vld [vmem:[#allocation2 + $0xac] sm:$0xf0]  ;;  %v2787_v25 = vor.u32 %v3534_v22, %v2786_v20  ;;  %1262 = vmatpush.bf16.msra.mxu1 %v2531_v17 }
   0xf   :  { %v2514_v26 = vld [vmem:[#allocation2 + $0x1a0] sm:$0xf]  ;;  %v3466_v27 = vld [vmem:[#allocation2 + $0x1ac] sm:$0xf0]  ;;  %v2387_v29 = vor.u32 %v3434_v24, %v2386_v23  ;;  %1275 = vmatpush.bf16.msra.mxu2 %v2659_v21 }
  0x10   :  { %v2642_v28 = vld [vmem:[#allocation2 + $0x2a0] sm:$0xf]  ;;  %v3498_v30 = vld [vmem:[#allocation2 + $0x2ac] sm:$0xf0]  ;;  %v2515_v33 = vor.u32 %v3466_v27, %v2514_v26  ;;  %1288 = vmatpush.bf16.msra.mxu3 %v2787_v25 }
  0x11   :  { %v2770_v31 = vld [vmem:[#allocation2 + $0x3a0] sm:$0xf]  ;;  %v3530_v32 = vld [vmem:[#allocation2 + $0x3ac] sm:$0xf0]  ;;  %v2643_v34 = vor.u32 %v3498_v30, %v2642_v28  ;;  %1250 = vmatpush.bf16.msra.mxu0 %v2387_v29 }
  0x12   :  { %v2370_v35 = vld [vmem:[#allocation2 + $0x80] sm:$0xf]  ;;  %v3430_v36 = vld [vmem:[#allocation2 + $0x8c] sm:$0xf0]  ;;  %v2771_v38 = vor.u32 %v3530_v32, %v2770_v31  ;;  %1263 = vmatpush.bf16.msra.mxu1 %v2515_v33  ;;  %v3440_v33 = vld [vmem:[#allocation2 + $0xe4] sm:$0xf] }
  0x13   :  { %v2498_v37 = vld [vmem:[#allocation2 + $0x180] sm:$0xf]  ;;  %v3462_v39 = vld [vmem:[#allocation2 + $0x18c] sm:$0xf0]  ;;  %v2371_v44 = vor.u32 %v3430_v36, %v2370_v35  ;;  %1276 = vmatpush.bf16.msra.mxu2 %v2643_v34  ;;  %v2420_v34 = vld [vmem:[#allocation2 + $0xf0] sm:$0xf0] }
  0x14   :  { %v2626_v40 = vld [vmem:[#allocation2 + $0x280] sm:$0xf]  ;;  %v3494_v41 = vld [vmem:[#allocation2 + $0x28c] sm:$0xf0]  ;;  %v2499_v45 = vor.u32 %v3462_v39, %v2498_v37  ;;  %1289 = vmatpush.bf16.msra.mxu3 %v2771_v38 }
  0x15   :  { %v2754_v42 = vld [vmem:[#allocation2 + $0x380] sm:$0xf]  ;;  %v3526_v43 = vld [vmem:[#allocation2 + $0x38c] sm:$0xf0]  ;;  %v2627_v46 = vor.u32 %v3494_v41, %v2626_v40  ;;  %1251 = vmatpush.bf16.msra.mxu0 %v2371_v44  ;;  %v2548_v44 = vld [vmem:[#allocation2 + $0x1f0] sm:$0xf0] }
  0x16   :  { %v2354_v47 = vld [vmem:[#allocation2 + $0x60] sm:$0xf]  ;;  %v3426_v48 = vld [vmem:[#allocation2 + $0x6c] sm:$0xf0]  ;;  %v2755_v50 = vor.u32 %v3526_v43, %v2754_v42  ;;  %1264 = vmatpush.bf16.msra.mxu1 %v2499_v45  ;;  %v3472_v43 = vld [vmem:[#allocation2 + $0x1e4] sm:$0xf] }
  0x17   :  { %v2482_v49 = vld [vmem:[#allocation2 + $0x160] sm:$0xf]  ;;  %v3458_v51 = vld [vmem:[#allocation2 + $0x16c] sm:$0xf0]  ;;  %v2355_v56 = vor.u32 %v3426_v48, %v2354_v47  ;;  %1277 = vmatpush.bf16.msra.mxu2 %v2627_v46  ;;  %v47_v45 = vld [vmem:[%s4329_s0 + $0x18] sm:$0xff]  ;;  %v2423_v47 = vor.u32 %v3440_v33, %v2420_v34 }
  0x18   :  { %v2610_v52 = vld [vmem:[#allocation2 + $0x260] sm:$0xf]  ;;  %v3490_v53 = vld [vmem:[#allocation2 + $0x26c] sm:$0xf0]  ;;  %v2483_v57 = vor.u32 %v3458_v51, %v2482_v49  ;;  %1290 = vmatpush.bf16.msra.mxu3 %v2755_v50 }
  0x19   :  { %v2738_v54 = vld [vmem:[#allocation2 + $0x360] sm:$0xf]  ;;  %v3522_v55 = vld [vmem:[#allocation2 + $0x36c] sm:$0xf0]  ;;  %v2611_v58 = vor.u32 %v3490_v53, %v2610_v52  ;;  %1252 = vmatpush.bf16.msra.mxu0 %v2355_v56  ;;  %v3436_v53 = vld [vmem:[#allocation2 + $0xc4] sm:$0xf] }
  0x1a   :  { %v2338_v59 = vld [vmem:[#allocation2 + $0x40] sm:$0xf]  ;;  %v3422_v60 = vld [vmem:[#allocation2 + $0x4c] sm:$0xf0]  ;;  %v2739_v62 = vor.u32 %v3522_v55, %v2738_v54  ;;  %1265 = vmatpush.bf16.msra.mxu1 %v2483_v57  ;;  %v2404_v54 = vld [vmem:[#allocation2 + $0xd0] sm:$0xf0]  ;;  %v3809_v57 = vpack.c.bf16 %v47_v45, %v47_v45 }
  0x1b   :  { %v2466_v61 = vld [vmem:[#allocation2 + $0x140] sm:$0xf]  ;;  %v3454_v63 = vld [vmem:[#allocation2 + $0x14c] sm:$0xf0]  ;;  %v2339_v4 = vor.u32 %v3422_v60, %v2338_v59  ;;  %1278 = vmatpush.bf16.msra.mxu2 %v2611_v58  ;;  %v45_v58 = vld [vmem:[%s4329_s0 + $0x8] sm:$0xff]  ;;  %v2551_v59 = vor.u32 %v3472_v43, %v2548_v44 }
  0x1c   :  { %v2594_v0 = vld [vmem:[#allocation2 + $0x240] sm:$0xf]  ;;  %v3486_v1 = vld [vmem:[#allocation2 + $0x24c] sm:$0xf0]  ;;  %v2467_v5 = vor.u32 %v3454_v63, %v2466_v61  ;;  %1291 = vmatpush.bf16.msra.mxu3 %v2739_v62  ;;  %v3468_v61 = vld [vmem:[#allocation2 + $0x1c4] sm:$0xf] }
  0x1d   :  { %v2722_v2 = vld [vmem:[#allocation2 + $0x340] sm:$0xf]  ;;  %v3518_v3 = vld [vmem:[#allocation2 + $0x34c] sm:$0xf0]  ;;  %v2595_v6 = vor.u32 %v3486_v1, %v2594_v0  ;;  %1253 = vmatpush.bf16.msra.mxu0 %v2339_v4  ;;  %v2532_v62 = vld [vmem:[#allocation2 + $0x1d0] sm:$0xf0]  ;;  %v2407_v0 = vor.u32 %v3436_v53, %v2404_v54  ;;  %v3816_v4 = vpack.c.bf16 %v45_v58, %v45_v58 }
  0x1e   :  { %v2322_v7 = vld [vmem:[#allocation2 + $0x20] sm:$0xf]  ;;  %v3418_v8 = vld [vmem:[#allocation2 + $0x2c] sm:$0xf0]  ;;  %v2723_v10 = vor.u32 %v3518_v3, %v2722_v2  ;;  %1266 = vmatpush.bf16.msra.mxu1 %v2467_v5  ;;  %v3420_v43 = vld [vmem:[#allocation2 + $0x44] sm:$0xf] }
  0x1f   :  { %v2450_v9 = vld [vmem:[#allocation2 + $0x120] sm:$0xf]  ;;  %v3450_v11 = vld [vmem:[#allocation2 + $0x12c] sm:$0xf0]  ;;  %v2323_v16 = vor.u32 %v3418_v8, %v2322_v7  ;;  %1279 = vmatpush.bf16.msra.mxu2 %v2595_v6  ;;  %v3432_v6 = vld [vmem:[#allocation2 + $0xa4] sm:$0xf]  ;;  %v2535_v8 = vor.u32 %v3468_v61, %v2532_v62 }
  0x20   :  { %v2578_v12 = vld [vmem:[#allocation2 + $0x220] sm:$0xf]  ;;  %v3482_v13 = vld [vmem:[#allocation2 + $0x22c] sm:$0xf0]  ;;  %v2451_v20 = vor.u32 %v3450_v11, %v2450_v9  ;;  %1292 = vmatpush.bf16.msra.mxu3 %v2723_v10  ;;  %v2388_v7 = vld [vmem:[#allocation2 + $0xb0] sm:$0xf0] }
  0x21   :  { %v2706_v14 = vld [vmem:[#allocation2 + $0x320] sm:$0xf]  ;;  %v3514_v15 = vld [vmem:[#allocation2 + $0x32c] sm:$0xf0]  ;;  %v2579_v21 = vor.u32 %v3482_v13, %v2578_v12  ;;  %1254 = vmatpush.bf16.msra.mxu0 %v2323_v16  ;;  %v3464_v10 = vld [vmem:[#allocation2 + $0x1a4] sm:$0xf]  ;;  %v2391_v13 = vor.u32 %v3432_v6, %v2388_v7 }
  0x22   :  { %v2306_v17 = vld [vmem:[#allocation2] sm:$0xf]  ;;  %v3414_v18 = vld [vmem:[#allocation2 + $0xc] sm:$0xf0]  ;;  %v2707_v25 = vor.u32 %v3514_v15, %v2706_v14  ;;  %1267 = vmatpush.bf16.msra.mxu1 %v2451_v20  ;;  %v2516_v11 = vld [vmem:[#allocation2 + $0x1b0] sm:$0xf0] }
  0x23   :  { %v2434_v19 = vld [vmem:[#allocation2 + $0x100] sm:$0xf]  ;;  %v3446_v22 = vld [vmem:[#allocation2 + $0x10c] sm:$0xf0]  ;;  %v2307_v32 = vor.u32 %v3414_v18, %v2306_v17  ;;  %1280 = vmatpush.bf16.msra.mxu2 %v2579_v21  ;;  %v3428_v18 = vld [vmem:[#allocation2 + $0x84] sm:$0xf]  ;;  %v2519_v20 = vor.u32 %v3464_v10, %v2516_v11 }
  0x24   :  { %v2562_v23 = vld [vmem:[#allocation2 + $0x200] sm:$0xf]  ;;  %v3478_v24 = vld [vmem:[#allocation2 + $0x20c] sm:$0xf0]  ;;  %v2435_v36 = vor.u32 %v3446_v22, %v2434_v19  ;;  %1293 = vmatpush.bf16.msra.mxu3 %v2707_v25  ;;  %v2372_v19 = vld [vmem:[#allocation2 + $0x90] sm:$0xf0] }
  0x25   :  { %v2690_v26 = vld [vmem:[#allocation2 + $0x300] sm:$0xf]  ;;  %v3510_v27 = vld [vmem:[#allocation2 + $0x30c] sm:$0xf0]  ;;  %v2563_v37 = vor.u32 %v3478_v24, %v2562_v23  ;;  %1255 = vmatpush.bf16.msra.mxu0 %v2307_v32  ;;  %v3460_v22 = vld [vmem:[#allocation2 + $0x184] sm:$0xf]  ;;  %v2375_v25 = vor.u32 %v3428_v18, %v2372_v19 }
  0x26   :  { %v2930_v28 = vld [vmem:[#allocation2 + $0x4e0] sm:$0xf]  ;;  %v3570_v29 = vld [vmem:[#allocation2 + $0x4ec] sm:$0xf0]  ;;  %v2691_v41 = vor.u32 %v3510_v27, %v2690_v26  ;;  %1268 = vmatpush.bf16.msra.mxu1 %v2435_v36  ;;  %v2500_v23 = vld [vmem:[#allocation2 + $0x190] sm:$0xf0] }
  0x27   :  { %v3058_v30 = vld [vmem:[#allocation2 + $0x5e0] sm:$0xf]  ;;  %v3602_v31 = vld [vmem:[#allocation2 + $0x5ec] sm:$0xf0]  ;;  %v2931_v42 = vor.u32 %v3570_v29, %v2930_v28  ;;  %1281 = vmatpush.bf16.msra.mxu2 %v2563_v37  ;;  %v2503_v33 = vor.u32 %v3460_v22, %v2500_v23  ;;  %v2484_v36 = vld [vmem:[#allocation2 + $0x170] sm:$0xf0] }
  0x28   :  { %v46_v35 = vld [vmem:[%s4329_s0 + $0x10] sm:$0xff]  ;;  %v3074_v38 = vld [vmem:[#allocation2 + $0x600] sm:$0xf]  ;;  %v3059_v46 = vor.u32 %v3602_v31, %v3058_v30  ;;  %1294 = vmatpush.bf16.msra.mxu3 %v2691_v41  ;;  %v3424_v30 = vld [vmem:[#allocation2 + $0x64] sm:$0xf] }
  0x29   :  { %v3606_v39 = vld [vmem:[#allocation2 + $0x60c] sm:$0xf0]  ;;  %v44_v40 = vld [vmem:[%s4329_s0] sm:$0xff]  ;;  %v3805_v51 = vpack.c.bf16 %v46_v35, %v46_v35  ;;  %1300 = vmatpush.bf16.msrb.mxu0 %v2931_v42  ;;  %1269 = vmatmul.bf16.vlgmr.msra.gmra.mxu1 %v3816_v4  ;;  %v2356_v31 = vld [vmem:[#allocation2 + $0x70] sm:$0xf0] }
  0x2a   :  { %v2914_v48 = vld [vmem:[#allocation2 + $0x4c0] sm:$0xf]  ;;  %v3566_v49 = vld [vmem:[#allocation2 + $0x4cc] sm:$0xf0]  ;;  %v3807_v55 = vpack.c.bf16 %v44_v40, %v44_v40  ;;  %v3075_v56 = vor.u32 %v3606_v39, %v3074_v38  ;;  %1313 = vmatpush.bf16.msrb.mxu1 %v3059_v46  ;;  %v3456_v35 = vld [vmem:[#allocation2 + $0x164] sm:$0xf]  ;;  %v2359_v38 = vor.u32 %v3424_v30, %v2356_v31 }
  0x2b   :  { %v3042_v50 = vld [vmem:[#allocation2 + $0x5c0] sm:$0xf]  ;;  %v3598_v52 = vld [vmem:[#allocation2 + $0x5cc] sm:$0xf0]  ;;  %v2915_v60 = vor.u32 %v3566_v49, %v2914_v48  ;;  %1282 = vmatmul.bf16.vlgmr.msra.gmra.mxu2 %v3805_v51  ;;  %1295 = vmatmul.bf16.vlgmr.msra.gmra.mxu3 %v3809_v57  ;;  %v2340_v44 = vld [vmem:[#allocation2 + $0x50] sm:$0xf0]  ;;  %v2487_v46 = vor.u32 %v3456_v35, %v2484_v36 }
  0x2c   :  { %1339 = vmatpush.bf16.msrb.mxu3 %v2423_v47  ;;  %v3043_v63 = vor.u32 %v3598_v52, %v3042_v50  ;;  %v2898_v1 = vld [vmem:[#allocation2 + $0x4a0] sm:$0xf]  ;;  %v3562_v2 = vld [vmem:[#allocation2 + $0x4ac] sm:$0xf0]  ;;  %1256 = vmatmul.bf16.vlgmr.msra.gmra.mxu0 %v3807_v55  ;;  %v3452_v48 = vld [vmem:[#allocation2 + $0x144] sm:$0xf]  ;;  %v2343_v52 = vor.u32 %v3420_v43, %v2340_v44 }
  0x2d   :  { %v3026_v3 = vld [vmem:[#allocation2 + $0x5a0] sm:$0xf]  ;;  %v3594_v5 = vld [vmem:[#allocation2 + $0x5ac] sm:$0xf0]  ;;  %1333 = vmatpush.bf16.msrb.mxu2 %v3075_v56  ;;  %1301 = vmatpush.bf16.msrb.mxu0 %v2915_v60  ;;  %v2899_v9 = vor.u32 %v3562_v2, %v2898_v1  ;;  %v2468_v49 = vld [vmem:[#allocation2 + $0x150] sm:$0xf0] }
  0x2e   :  { %1314 = vmatpush.bf16.msrb.mxu1 %v3043_v63  ;;  %v3027_v12 = vor.u32 %v3594_v5, %v3026_v3  ;;  %v2882_v14 = vld [vmem:[#allocation2 + $0x480] sm:$0xf]  ;;  %v3558_v15 = vld [vmem:[#allocation2 + $0x48c] sm:$0xf0]  ;;  %v2324_v60 = vld [vmem:[#allocation2 + $0x30] sm:$0xf0]  ;;  %v2471_v61 = vor.u32 %v3452_v48, %v2468_v49 }
  0x2f   :  { %v3010_v16 = vld [vmem:[#allocation2 + $0x580] sm:$0xf]  ;;  %v3590_v17 = vld [vmem:[#allocation2 + $0x58c] sm:$0xf0]  ;;  %v2883_v21 = vor.u32 %v3558_v15, %v2882_v14  ;;  %v3448_v63 = vld [vmem:[#allocation2 + $0x124] sm:$0xf] }
  0x30   :  { %1340 = vmatpush.bf16.msrb.mxu3 %v2407_v0  ;;  %v3011_v24 = vor.u32 %v3590_v17, %v3010_v16  ;;  %v2866_v26 = vld [vmem:[#allocation2 + $0x460] sm:$0xf]  ;;  %v3554_v27 = vld [vmem:[#allocation2 + $0x46c] sm:$0xf0]  ;;  %v2452_v0 = vld [vmem:[#allocation2 + $0x130] sm:$0xf0] }
  0x31   :  { %1352 = vmatpush.bf16.msra.mxu2 %v2551_v59  ;;  %1302 = vmatpush.bf16.msrb.mxu0 %v2899_v9  ;;  %v2994_v28 = vld [vmem:[#allocation2 + $0x560] sm:$0xf]  ;;  %v3586_v29 = vld [vmem:[#allocation2 + $0x56c] sm:$0xf0]  ;;  %v2867_v34 = vor.u32 %v3554_v27, %v2866_v26  ;;  %v3416_v59 = vld [vmem:[#allocation2 + $0x24] sm:$0xf]  ;;  %v2455_v14 = vor.u32 %v3448_v63, %v2452_v0 }
  0x32   :  { %1315 = vmatpush.bf16.msrb.mxu1 %v3027_v12  ;;  %v50_v32 = vld [vmem:[%s4329_s0 + $0x30] sm:$0xff]  ;;  %v2995_v37 = vor.u32 %v3586_v29, %v2994_v28  ;;  %v2850_v39 = vld [vmem:[#allocation2 + $0x440] sm:$0xf]  ;;  %v2327_v3 = vor.u32 %v3416_v59, %v2324_v60  ;;  %v3504_v10 = vld [vmem:[#allocation2 + $0x2e4] sm:$0xf] }
  0x33   :  { %v3550_v40 = vld [vmem:[#allocation2 + $0x44c] sm:$0xf0]  ;;  %v2978_v41 = vld [vmem:[#allocation2 + $0x540] sm:$0xf]  ;;  %v3823_v45 = vpack.c.bf16 %v50_v32, %v50_v32  ;;  %v2308_v9 = vld [vmem:[#allocation2 + $0x10] sm:$0xf0] }
  0x34   :  { %1341 = vmatpush.bf16.msrb.mxu3 %v2391_v13  ;;  %v3582_v42 = vld [vmem:[#allocation2 + $0x54c] sm:$0xf0]  ;;  %v2851_v47 = vor.u32 %v3550_v40, %v2850_v39  ;;  %v2834_v53 = vld [vmem:[#allocation2 + $0x420] sm:$0xf]  ;;  %v2676_v11 = vld [vmem:[#allocation2 + $0x2f0] sm:$0xf0] }
  0x35   :  { %1353 = vmatpush.bf16.msra.mxu2 %v2535_v8  ;;  %1303 = vmatpush.bf16.msrb.mxu0 %v2883_v21  ;;  %v2979_v50 = vor.u32 %v3582_v42, %v2978_v41  ;;  %v3546_v54 = vld [vmem:[#allocation2 + $0x42c] sm:$0xf0]  ;;  %v2962_v56 = vld [vmem:[#allocation2 + $0x520] sm:$0xf]  ;;  %v3412_v8 = vld [vmem:[#allocation2 + $0x4] sm:$0xf] }
  0x36   :  { %1316 = vmatpush.bf16.msrb.mxu1 %v3011_v24  ;;  %v3578_v58 = vld [vmem:[#allocation2 + $0x52c] sm:$0xf0]  ;;  %v2835_v62 = vor.u32 %v3546_v54, %v2834_v53  ;;  %v2818_v1 = vld [vmem:[#allocation2 + $0x400] sm:$0xf]  ;;  %v3536_v12 = vld [vmem:[#allocation2 + $0x3e4] sm:$0xf]  ;;  %v2679_v24 = vor.u32 %v3504_v10, %v2676_v11 }
  0x37   :  { %v2963_v2 = vor.u32 %v3578_v58, %v2962_v56  ;;  %v3542_v5 = vld [vmem:[#allocation2 + $0x40c] sm:$0xf0]  ;;  %v2946_v6 = vld [vmem:[#allocation2 + $0x500] sm:$0xf]  ;;  %v2804_v13 = vld [vmem:[#allocation2 + $0x3f0] sm:$0xf0] }
  0x38   :  { %1342 = vmatpush.bf16.msrb.mxu3 %v2375_v25  ;;  %v3574_v7 = vld [vmem:[#allocation2 + $0x50c] sm:$0xf0]  ;;  %v2819_v15 = vor.u32 %v3542_v5, %v2818_v1  ;;  %v3568_v16 = vld [vmem:[#allocation2 + $0x4e4] sm:$0xf]  ;;  %v2932_v17 = vld [vmem:[#allocation2 + $0x4f0] sm:$0xf0]  ;;  %v2807_v25 = vor.u32 %v3536_v12, %v2804_v13 }
  0x39   :  { %1354 = vmatpush.bf16.msra.mxu2 %v2519_v20  ;;  %1304 = vmatpush.bf16.msrb.mxu0 %v2867_v34  ;;  %v48_v18 = vld [vmem:[%s4329_s0 + $0x20] sm:$0xff]  ;;  %v2947_v19 = vor.u32 %v3574_v7, %v2946_v6  ;;  %v2311_v20 = vor.u32 %v3412_v8, %v2308_v9  ;;  %v2436_v22 = vld [vmem:[#allocation2 + $0x110] sm:$0xf0]  ;;  %v49_v23 = vld [vmem:[%s4329_s0 + $0x28] sm:$0xff]  ;;  %v2935_v29 = vor.u32 %v3568_v16, %v2932_v17 }
  0x3a   :  { %1317 = vmatpush.bf16.msrb.mxu1 %v2995_v37  ;;  %v3444_v21 = vld [vmem:[#allocation2 + $0x104] sm:$0xf]  ;;  %v3060_v27 = vld [vmem:[#allocation2 + $0x5f0] sm:$0xf0]  ;;  %v3833_v30 = vpack.c.bf16 %v48_v18, %v48_v18  ;;  %v3835_v35 = vpack.c.bf16 %v49_v23, %v49_v23 }
  0x3b   :  { %3088 = vmatmul.msk.bf16.vlgmr.msrb.gmra.mxu2 %vm1244_vm0, %v3823_v45  ;;  %v3600_v26 = vld [vmem:[#allocation2 + $0x5e4] sm:$0xf]  ;;  %v2660_v31 = vld [vmem:[#allocation2 + $0x2d0] sm:$0xf0]  ;;  %v2439_v34 = vor.u32 %v3444_v21, %v2436_v22 }
  0x3c   :  { %1343 = vmatpush.bf16.msrb.mxu3 %v2359_v38  ;;  %v3500_v28 = vld [vmem:[#allocation2 + $0x2c4] sm:$0xf]  ;;  %v2916_v37 = vld [vmem:[#allocation2 + $0x4d0] sm:$0xf0]  ;;  %v3063_v38 = vor.u32 %v3600_v26, %v3060_v27 }
  0x3d   :  { %1355 = vmatpush.bf16.msra.mxu2 %v2503_v33  ;;  %1305 = vmatpush.bf16.msrb.mxu0 %v2851_v47  ;;  %v3532_v32 = vld [vmem:[#allocation2 + $0x3c4] sm:$0xf]  ;;  %v2788_v33 = vld [vmem:[#allocation2 + $0x3d0] sm:$0xf0]  ;;  %v2663_v39 = vor.u32 %v3500_v28, %v2660_v31 }
  0x3e   :  { %1318 = vmatpush.bf16.msrb.mxu1 %v2979_v50  ;;  %v3564_v36 = vld [vmem:[#allocation2 + $0x4c4] sm:$0xf]  ;;  %v2791_v40 = vor.u32 %v3532_v32, %v2788_v33  ;;  %v3044_v42 = vld [vmem:[#allocation2 + $0x5d0] sm:$0xf0] }
  0x3f   :  { %v3596_v41 = vld [vmem:[#allocation2 + $0x5c4] sm:$0xf]  ;;  %v2919_v44 = vor.u32 %v3564_v36, %v2916_v37  ;;  %v2772_v48 = vld [vmem:[#allocation2 + $0x3b0] sm:$0xf0] }
  0x40   :  { %1344 = vmatpush.bf16.msrb.mxu3 %v2343_v52  ;;  %v3496_v43 = vld [vmem:[#allocation2 + $0x2a4] sm:$0xf]  ;;  %v2900_v50 = vld [vmem:[#allocation2 + $0x4b0] sm:$0xf0]  ;;  %v3047_v52 = vor.u32 %v3596_v41, %v3044_v42 }
  0x41   :  { %1356 = vmatpush.bf16.msra.mxu2 %v2487_v46  ;;  %1306 = vmatpush.bf16.msrb.mxu0 %v2835_v62  ;;  %v2644_v46 = vld [vmem:[#allocation2 + $0x2b0] sm:$0xf0]  ;;  %v3528_v47 = vld [vmem:[#allocation2 + $0x3a4] sm:$0xf] }
  0x42   :  { %1319 = vmatpush.bf16.msrb.mxu1 %v2963_v2  ;;  %v3560_v49 = vld [vmem:[#allocation2 + $0x4a4] sm:$0xf]  ;;  %v2647_v53 = vor.u32 %v3496_v43, %v2644_v46  ;;  %v2775_v54 = vor.u32 %v3528_v47, %v2772_v48  ;;  %v3028_v58 = vld [vmem:[#allocation2 + $0x5b0] sm:$0xf0] }
  0x43   :  { %v3592_v56 = vld [vmem:[#allocation2 + $0x5a4] sm:$0xf]  ;;  %v2903_v60 = vor.u32 %v3560_v49, %v2900_v50  ;;  %v2756_v63 = vld [vmem:[#allocation2 + $0x390] sm:$0xf0] }
  0x44   :  { %1345 = vmatpush.bf16.msrb.mxu3 %v2327_v3  ;;  %v3492_v59 = vld [vmem:[#allocation2 + $0x284] sm:$0xf]  ;;  %v2884_v1 = vld [vmem:[#allocation2 + $0x490] sm:$0xf0]  ;;  %v3031_v2 = vor.u32 %v3592_v56, %v3028_v58  ;;  %v2426_v56 = vld [vmem:[#allocation2 + $0xe8] sm:$0xf] }
  0x45   :  { %1357 = vmatpush.bf16.msra.mxu2 %v2471_v61  ;;  %1307 = vmatpush.bf16.msrb.mxu0 %v2819_v15  ;;  %v2628_v61 = vld [vmem:[#allocation2 + $0x290] sm:$0xf0]  ;;  %v3524_v62 = vld [vmem:[#allocation2 + $0x384] sm:$0xf]  ;;  %v3443_v58 = vld [vmem:[#allocation2 + $0xf4] sm:$0xf0] }
  0x46   :  { %1320 = vmatpush.bf16.msrb.mxu1 %v2947_v19  ;;  %v3556_v0 = vld [vmem:[#allocation2 + $0x484] sm:$0xf]  ;;  %v2631_v3 = vor.u32 %v3492_v59, %v2628_v61  ;;  %v2759_v5 = vor.u32 %v3524_v62, %v2756_v63  ;;  %v3012_v7 = vld [vmem:[#allocation2 + $0x590] sm:$0xf0]  ;;  %v2554_v59 = vld [vmem:[#allocation2 + $0x1e8] sm:$0xf] }
  0x47   :  { %v3588_v6 = vld [vmem:[#allocation2 + $0x584] sm:$0xf]  ;;  %v2887_v9 = vor.u32 %v3556_v0, %v2884_v1  ;;  %v2612_v10 = vld [vmem:[#allocation2 + $0x270] sm:$0xf0]  ;;  %v3475_v61 = vld [vmem:[#allocation2 + $0x1f4] sm:$0xf0] }
  0x48   :  { %1346 = vmatpush.bf16.msrb.mxu3 %v2311_v20  ;;  %1308 = vmatmul.bf16.vlgmr.msrb.gmra.mxu0 %v3833_v30  ;;  %v3488_v8 = vld [vmem:[#allocation2 + $0x264] sm:$0xf]  ;;  %v2740_v12 = vld [vmem:[#allocation2 + $0x370] sm:$0xf0]  ;;  %v3015_v15 = vor.u32 %v3588_v6, %v3012_v7  ;;  %v2427_v6 = vor.u32 %v3443_v58, %v2426_v56  ;;  %v2810_v7 = vld [vmem:[#allocation2 + $0x3e8] sm:$0xf] }
  0x49   :  { %1358 = vmatpush.bf16.msra.mxu2 %v2455_v14  ;;  %1365 = vmatpush.bf16.msra.mxu0 %v2679_v24  ;;  %v3520_v11 = vld [vmem:[#allocation2 + $0x364] sm:$0xf]  ;;  %v2868_v14 = vld [vmem:[#allocation2 + $0x470] sm:$0xf0]  ;;  %v2615_v16 = vor.u32 %v3488_v8, %v2612_v10  ;;  %v3539_v8 = vld [vmem:[#allocation2 + $0x3f4] sm:$0xf0]  ;;  %v2555_v10 = vor.u32 %v3475_v61, %v2554_v59 }
  0x4a   :  { %1378 = vmatpush.bf16.msra.mxu1 %v2807_v25  ;;  %v3552_v13 = vld [vmem:[#allocation2 + $0x464] sm:$0xf]  ;;  %v2743_v17 = vor.u32 %v3520_v11, %v2740_v12  ;;  %v2996_v19 = vld [vmem:[#allocation2 + $0x570] sm:$0xf0]  ;;  %v3439_v11 = vld [vmem:[#allocation2 + $0xd4] sm:$0xf0] }
  0x4b   :  { %1321 = vmatmul.bf16.vlgmr.msrb.gmra.mxu1 %v3835_v35  ;;  %1347 = vmatmul.bf16.vlgmr.msrb.gmra.mxu3 %v3807_v55  ;;  %v3584_v18 = vld [vmem:[#allocation2 + $0x564] sm:$0xf]  ;;  %v2871_v21 = vor.u32 %v3552_v13, %v2868_v14  ;;  %v2596_v22 = vld [vmem:[#allocation2 + $0x250] sm:$0xf0]  ;;  %v2682_v13 = vld [vmem:[#allocation2 + $0x2e8] sm:$0xf] }
  0x4c   :  { %1391 = vmatpush.bf16.msra.mxu3 %v2935_v29  ;;  %v3484_v20 = vld [vmem:[#allocation2 + $0x244] sm:$0xf]  ;;  %v2724_v24 = vld [vmem:[#allocation2 + $0x350] sm:$0xf0]  ;;  %v2999_v27 = vor.u32 %v3584_v18, %v2996_v19  ;;  %v3507_v14 = vld [vmem:[#allocation2 + $0x2f4] sm:$0xf0]  ;;  %v2811_v18 = vor.u32 %v3539_v8, %v2810_v7 }
  0x4d   :  { %1359 = vmatpush.bf16.msra.mxu2 %v2439_v34  ;;  %1366 = vmatpush.bf16.msra.mxu0 %v2663_v39  ;;  %v3516_v23 = vld [vmem:[#allocation2 + $0x344] sm:$0xf]  ;;  %v2852_v26 = vld [vmem:[#allocation2 + $0x450] sm:$0xf0]  ;;  %v2599_v28 = vor.u32 %v3484_v20, %v2596_v22  ;;  %v2794_v20 = vld [vmem:[#allocation2 + $0x3c8] sm:$0xf] }
  0x4e   :  { %1379 = vmatpush.bf16.msra.mxu1 %v2791_v40  ;;  %v3548_v25 = vld [vmem:[#allocation2 + $0x444] sm:$0xf]  ;;  %v2727_v29 = vor.u32 %v3516_v23, %v2724_v24  ;;  %v2980_v32 = vld [vmem:[#allocation2 + $0x550] sm:$0xf0]  ;;  %v2394_v22 = vld [vmem:[#allocation2 + $0xa8] sm:$0xf]  ;;  %v2683_v23 = vor.u32 %v3507_v14, %v2682_v13 }
  0x4f   :  { %v3580_v31 = vld [vmem:[#allocation2 + $0x544] sm:$0xf]  ;;  %v2855_v34 = vor.u32 %v3548_v25, %v2852_v26  ;;  %v2580_v36 = vld [vmem:[#allocation2 + $0x230] sm:$0xf0]  ;;  %v3435_v25 = vld [vmem:[#allocation2 + $0xb4] sm:$0xf0] }
  0x50   :  { %1392 = vmatpush.bf16.msra.mxu3 %v2919_v44  ;;  %1360 = vmatmul.bf16.vlgmr.msra.gmra.mxu2 %v3816_v4  ;;  %v3480_v33 = vld [vmem:[#allocation2 + $0x224] sm:$0xf]  ;;  %v2836_v40 = vld [vmem:[#allocation2 + $0x430] sm:$0xf0]  ;;  %v2983_v41 = vor.u32 %v3580_v31, %v2980_v32  ;;  %v2666_v26 = vld [vmem:[#allocation2 + $0x2c8] sm:$0xf]  ;;  %v2395_v32 = vor.u32 %v3435_v25, %v2394_v22 }
  0x51   :  { %1404 = vmatpush.bf16.msrb.mxu2 %v3063_v38  ;;  %1367 = vmatpush.bf16.msra.mxu0 %v2647_v53  ;;  %v3512_v37 = vld [vmem:[#allocation2 + $0x324] sm:$0xf]  ;;  %v2708_v38 = vld [vmem:[#allocation2 + $0x330] sm:$0xf0]  ;;  %v2583_v46 = vor.u32 %v3480_v33, %v2580_v36  ;;  %v2778_v33 = vld [vmem:[#allocation2 + $0x3a8] sm:$0xf] }
  0x52   :  { %1380 = vmatpush.bf16.msra.mxu1 %v2775_v54  ;;  %v3544_v39 = vld [vmem:[#allocation2 + $0x424] sm:$0xf]  ;;  %v2964_v43 = vld [vmem:[#allocation2 + $0x530] sm:$0xf0]  ;;  %v2711_v47 = vor.u32 %v3512_v37, %v2708_v38  ;;  %v2378_v36 = vld [vmem:[#allocation2 + $0x88] sm:$0xf] }
  0x53   :  { %v3576_v42 = vld [vmem:[#allocation2 + $0x524] sm:$0xf]  ;;  %v2564_v48 = vld [vmem:[#allocation2 + $0x210] sm:$0xf0]  ;;  %v3495_v56 = vld [vmem:[#allocation2 + $0x294] sm:$0xf0] }
  0x54   :  { %1393 = vmatpush.bf16.msra.mxu3 %v2903_v60  ;;  %v3476_v44 = vld [vmem:[#allocation2 + $0x204] sm:$0xf]  ;;  %v2692_v50 = vld [vmem:[#allocation2 + $0x310] sm:$0xf0]  ;;  %v2967_v60 = vor.u32 %v3576_v42, %v2964_v43  ;;  %v2506_v42 = vld [vmem:[#allocation2 + $0x188] sm:$0xf] }
  0x55   :  { %1405 = vmatpush.bf16.msrb.mxu2 %v3047_v52  ;;  %1368 = vmatpush.bf16.msra.mxu0 %v2631_v3  ;;  %v3508_v49 = vld [vmem:[#allocation2 + $0x304] sm:$0xf]  ;;  %v2839_v52 = vor.u32 %v3544_v39, %v2836_v40  ;;  %v2820_v54 = vld [vmem:[#allocation2 + $0x410] sm:$0xf0]  ;;  %v2567_v0 = vor.u32 %v3476_v44, %v2564_v48  ;;  %v3431_v39 = vld [vmem:[#allocation2 + $0x94] sm:$0xf0] }
  0x56   :  { %1381 = vmatpush.bf16.msra.mxu1 %v2759_v5  ;;  %v3540_v53 = vld [vmem:[#allocation2 + $0x404] sm:$0xf]  ;;  %v3076_v63 = vld [vmem:[#allocation2 + $0x610] sm:$0xf0]  ;;  %v2695_v1 = vor.u32 %v3508_v49, %v2692_v50  ;;  %v2650_v40 = vld [vmem:[#allocation2 + $0x2a8] sm:$0xf] }
  0x57   :  { %v3604_v62 = vld [vmem:[#allocation2 + $0x604] sm:$0xf]  ;;  %v2948_v3 = vld [vmem:[#allocation2 + $0x510] sm:$0xf0]  ;;  %v2823_v5 = vor.u32 %v3540_v53, %v2820_v54  ;;  %v3463_v43 = vld [vmem:[#allocation2 + $0x194] sm:$0xf0] }
  0x58   :  { %1394 = vmatpush.bf16.msra.mxu3 %v2887_v9  ;;  %v2410_v9 = vld [vmem:[#allocation2 + $0xc8] sm:$0xf]  ;;  %v3079_v12 = vor.u32 %v3604_v62, %v3076_v63  ;;  %v3527_v48 = vld [vmem:[#allocation2 + $0x394] sm:$0xf0] }
  0x59   :  { %1406 = vmatpush.bf16.msrb.mxu2 %v3031_v2  ;;  %1369 = vmatpush.bf16.msra.mxu0 %v2615_v16  ;;  %v3572_v2 = vld [vmem:[#allocation2 + $0x504] sm:$0xf]  ;;  %v2538_v16 = vld [vmem:[#allocation2 + $0x1c8] sm:$0xf]  ;;  %v2411_v19 = vor.u32 %v3439_v11, %v2410_v9  ;;  %v3427_v53 = vld [vmem:[#allocation2 + $0x74] sm:$0xf0] }
  0x5a   :  { %1382 = vmatpush.bf16.msra.mxu1 %v2743_v17  ;;  %v3471_v17 = vld [vmem:[#allocation2 + $0x1d4] sm:$0xf0]  ;;  %v2362_v49 = vld [vmem:[#allocation2 + $0x68] sm:$0xf] }
  0x5b   :  { %v2539_v24 = vor.u32 %v3471_v17, %v2538_v16  ;;  %v2634_v54 = vld [vmem:[#allocation2 + $0x288] sm:$0xf]  ;;  %v3459_v59 = vld [vmem:[#allocation2 + $0x174] sm:$0xf0]  ;;  %v2363_v61 = vor.u32 %v3427_v53, %v2362_v49 }
  0x5c   :  { %1395 = vmatpush.bf16.msra.mxu3 %v2871_v21  ;;  %v3535_v21 = vld [vmem:[#allocation2 + $0x3d4] sm:$0xf0]  ;;  %v2490_v58 = vld [vmem:[#allocation2 + $0x168] sm:$0xf] }
  0x5d   :  { %1407 = vmatpush.bf16.msrb.mxu2 %v3015_v15  ;;  %1370 = vmatpush.bf16.msra.mxu0 %v2599_v28  ;;  %v2951_v15 = vor.u32 %v3572_v2, %v2948_v3  ;;  %v2522_v28 = vld [vmem:[#allocation2 + $0x1a8] sm:$0xf]  ;;  %v2795_v31 = vor.u32 %v3535_v21, %v2794_v20  ;;  %v3523_v63 = vld [vmem:[#allocation2 + $0x374] sm:$0xf0]  ;;  %v2491_v2 = vor.u32 %v3459_v59, %v2490_v58 }
  0x5e   :  { %1383 = vmatpush.bf16.msra.mxu1 %v2727_v29  ;;  %v3467_v29 = vld [vmem:[#allocation2 + $0x1b4] sm:$0xf0]  ;;  %v2746_v62 = vld [vmem:[#allocation2 + $0x368] sm:$0xf] }
  0x5f   :  { %v2523_v38 = vor.u32 %v3467_v29, %v2522_v28  ;;  %v3423_v3 = vld [vmem:[#allocation2 + $0x54] sm:$0xf0]  ;;  %v2474_v7 = vld [vmem:[#allocation2 + $0x148] sm:$0xf]  ;;  %v2747_v9 = vor.u32 %v3523_v63, %v2746_v62 }
  0x60   :  { %1396 = vmatpush.bf16.msra.mxu3 %v2855_v34  ;;  %v3531_v34 = vld [vmem:[#allocation2 + $0x3b4] sm:$0xf0]  ;;  %v2730_v11 = vld [vmem:[#allocation2 + $0x348] sm:$0xf] }
  0x61   :  { %1408 = vmatpush.bf16.msrb.mxu2 %v2999_v27  ;;  %1371 = vmatpush.bf16.msra.mxu0 %v2583_v46  ;;  %v3503_v27 = vld [vmem:[#allocation2 + $0x2d4] sm:$0xf0]  ;;  %v2779_v44 = vor.u32 %v3531_v34, %v2778_v33  ;;  %v2379_v46 = vor.u32 %v3431_v39, %v2378_v36  ;;  %v2330_v13 = vld [vmem:[#allocation2 + $0x28] sm:$0xf] }
  0x62   :  { %1384 = vmatpush.bf16.msra.mxu1 %v2711_v47  ;;  %v2667_v37 = vor.u32 %v3503_v27, %v2666_v26  ;;  %v2762_v47 = vld [vmem:[#allocation2 + $0x388] sm:$0xf]  ;;  %v3455_v8 = vld [vmem:[#allocation2 + $0x154] sm:$0xf0] }
  0x63   :  { %v3419_v16 = vld [vmem:[#allocation2 + $0x34] sm:$0xf0]  ;;  %v2602_v17 = vld [vmem:[#allocation2 + $0x248] sm:$0xf] }
  0x64   :  { %1397 = vmatpush.bf16.msra.mxu3 %v2839_v52  ;;  %v2507_v52 = vor.u32 %v3463_v43, %v2506_v42  ;;  %v3451_v20 = vld [vmem:[#allocation2 + $0x134] sm:$0xf0]  ;;  %v2714_v22 = vld [vmem:[#allocation2 + $0x328] sm:$0xf] }
  0x65   :  { %1409 = vmatpush.bf16.msrb.mxu2 %v2983_v41  ;;  %1372 = vmatpush.bf16.msra.mxu0 %v2567_v0  ;;  %v3499_v41 = vld [vmem:[#allocation2 + $0x2b4] sm:$0xf0]  ;;  %v2346_v0 = vld [vmem:[#allocation2 + $0x48] sm:$0xf] }
  0x66   :  { %1385 = vmatpush.bf16.msra.mxu1 %v2695_v1  ;;  %v2651_v50 = vor.u32 %v3499_v41, %v2650_v40  ;;  %v2635_v1 = vor.u32 %v3495_v56, %v2634_v54  ;;  %v2314_v25 = vld [vmem:[#allocation2 + $0x8] sm:$0xf]  ;;  %v3415_v26 = vld [vmem:[#allocation2 + $0x14] sm:$0xf0] }
  0x67   :  { %v2442_v29 = vld [vmem:[#allocation2 + $0x108] sm:$0xf]  ;;  %v3447_v33 = vld [vmem:[#allocation2 + $0x114] sm:$0xf0]  ;;  %v2315_v41 = vor.u32 %v3415_v26, %v2314_v25  ;;  %v3429_v25 = vld [vmem:[#allocation2 + $0x8c] sm:$0xf] }
  0x68   :  { %1398 = vmatpush.bf16.msra.mxu3 %v2823_v5  ;;  %1373 = vmatmul.bf16.vlgmr.msra.gmra.mxu0 %v3805_v51  ;;  %v2618_v5 = vld [vmem:[#allocation2 + $0x268] sm:$0xf]  ;;  %v3571_v36 = vld [vmem:[#allocation2 + $0x4f4] sm:$0xf0] }
  0x69   :  { %1410 = vmatpush.bf16.msrb.mxu2 %v2967_v60  ;;  %1424 = vmatpush.bf16.msrb.mxu0 %v3079_v12  ;;  %v2763_v60 = vor.u32 %v3527_v48, %v2762_v47  ;;  %v3519_v12 = vld [vmem:[#allocation2 + $0x354] sm:$0xf0]  ;;  %v2938_v34 = vld [vmem:[#allocation2 + $0x4e8] sm:$0xf]  ;;  %v2443_v47 = vor.u32 %v3447_v33, %v2442_v29  ;;  %v3465_v29 = vld [vmem:[#allocation2 + $0x1ac] sm:$0xf] }
  0x6a   :  { %1430 = vmatpush.bf16.msrb.mxu1 %v2427_v6  ;;  %v3491_v6 = vld [vmem:[#allocation2 + $0x274] sm:$0xf0]  ;;  %v2731_v21 = vor.u32 %v3519_v12, %v2730_v11  ;;  %v2698_v40 = vld [vmem:[#allocation2 + $0x308] sm:$0xf]  ;;  %v2939_v48 = vor.u32 %v3571_v36, %v2938_v34 }
  0x6b   :  { %1399 = vmatmul.bf16.vlgmr.msra.gmra.mxu3 %v3833_v30  ;;  %1386 = vmatmul.bf16.vlgmr.msra.gmra.mxu1 %v3809_v57  ;;  %v2619_v14 = vor.u32 %v3491_v6, %v2618_v5  ;;  %v3603_v39 = vld [vmem:[#allocation2 + $0x5f4] sm:$0xf0]  ;;  %v2922_v49 = vld [vmem:[#allocation2 + $0x4c8] sm:$0xf]  ;;  %v3473_v5 = vld [vmem:[#allocation2 + $0x1ec] sm:$0xf] }
  0x6c   :  { %1443 = vmatpush.bf16.msrb.mxu3 %v2555_v10  ;;  %v2347_v10 = vor.u32 %v3423_v3, %v2346_v0  ;;  %v3511_v42 = vld [vmem:[#allocation2 + $0x314] sm:$0xf0]  ;;  %v3082_v56 = vld [vmem:[#allocation2 + $0x608] sm:$0xf]  ;;  %v3437_v0 = vld [vmem:[#allocation2 + $0xcc] sm:$0xf] }
  0x6d   :  { %1411 = vmatpush.bf16.msrb.mxu2 %v2951_v15  ;;  %1456 = vmatpush.bf16.msra.mxu0 %v2683_v23  ;;  %v2475_v15 = vor.u32 %v3455_v8, %v2474_v7  ;;  %v2331_v23 = vor.u32 %v3419_v16, %v2330_v13  ;;  %v3567_v54 = vld [vmem:[#allocation2 + $0x4d4] sm:$0xf0]  ;;  %v2699_v59 = vor.u32 %v3511_v42, %v2698_v40  ;;  %v2556_v6 = vld [vmem:[#allocation2 + $0x1f8] sm:$0xf0]  ;;  %v2906_v8 = vld [vmem:[#allocation2 + $0x4a8] sm:$0xf] }
  0x6e   :  { %1431 = vmatpush.bf16.msrb.mxu1 %v2411_v19  ;;  %v2458_v19 = vld [vmem:[#allocation2 + $0x128] sm:$0xf]  ;;  %v3607_v58 = vld [vmem:[#allocation2 + $0x614] sm:$0xf0]  ;;  %v3433_v13 = vld [vmem:[#allocation2 + $0xac] sm:$0xf] }
  0x6f   :  { %v2459_v28 = vor.u32 %v3451_v20, %v2458_v19  ;;  %v3083_v3 = vor.u32 %v3607_v58, %v3082_v56  ;;  %v3595_v11 = vld [vmem:[#allocation2 + $0x5b4] sm:$0xf0]  ;;  %v2396_v16 = vld [vmem:[#allocation2 + $0xb8] sm:$0xf0]  ;;  %v2890_v20 = vld [vmem:[#allocation2 + $0x488] sm:$0xf] }
  0x70   :  { %1444 = vmatpush.bf16.msrb.mxu3 %v2539_v24  ;;  %1412 = vmatmul.bf16.vlgmr.msrb.gmra.mxu2 %v3835_v35  ;;  %v3515_v24 = vld [vmem:[#allocation2 + $0x334] sm:$0xf0]  ;;  %v2874_v33 = vld [vmem:[#allocation2 + $0x468] sm:$0xf]  ;;  %v2364_v42 = vld [vmem:[#allocation2 + $0x78] sm:$0xf0] }
  0x71   :  { %1469 = vmatpush.bf16.msra.mxu2 %v2811_v18  ;;  %1457 = vmatpush.bf16.msra.mxu0 %v2667_v37  ;;  %v3487_v18 = vld [vmem:[#allocation2 + $0x254] sm:$0xf0]  ;;  %v2715_v37 = vor.u32 %v3515_v24, %v2714_v22  ;;  %v3018_v22 = vld [vmem:[#allocation2 + $0x588] sm:$0xf]  ;;  %v2399_v24 = vor.u32 %v3433_v13, %v2396_v16  ;;  %v2348_v58 = vld [vmem:[#allocation2 + $0x58] sm:$0xf0] }
  0x72   :  { %1432 = vmatpush.bf16.msrb.mxu1 %v2395_v32  ;;  %v2603_v27 = vor.u32 %v3487_v18, %v2602_v17  ;;  %v3483_v32 = vld [vmem:[#allocation2 + $0x234] sm:$0xf0]  ;;  %v3469_v17 = vld [vmem:[#allocation2 + $0x1cc] sm:$0xf]  ;;  %v2540_v18 = vld [vmem:[#allocation2 + $0x1d8] sm:$0xf0] }
  0x73   :  { %v2543_v26 = vor.u32 %v3469_v17, %v2540_v18  ;;  %v3555_v34 = vld [vmem:[#allocation2 + $0x474] sm:$0xf0]  ;;  %v3002_v36 = vld [vmem:[#allocation2 + $0x568] sm:$0xf]  ;;  %v2684_v16 = vld [vmem:[#allocation2 + $0x2f8] sm:$0xf0] }
  0x74   :  { %1445 = vmatpush.bf16.msrb.mxu3 %v2523_v38  ;;  %v3066_v38 = vld [vmem:[#allocation2 + $0x5e8] sm:$0xf]  ;;  %v3537_v18 = vld [vmem:[#allocation2 + $0x3ec] sm:$0xf] }
  0x75   :  { %1470 = vmatpush.bf16.msra.mxu2 %v2795_v31  ;;  %1458 = vmatpush.bf16.msra.mxu0 %v2651_v50  ;;  %v2586_v31 = vld [vmem:[#allocation2 + $0x228] sm:$0xf]  ;;  %v3067_v53 = vor.u32 %v3603_v39, %v3066_v38  ;;  %v3425_v39 = vld [vmem:[#allocation2 + $0x6c] sm:$0xf] }
  0x76   :  { %1433 = vmatpush.bf16.msrb.mxu1 %v2379_v46  ;;  %v2587_v43 = vor.u32 %v3483_v32, %v2586_v31  ;;  %v2428_v46 = vld [vmem:[#allocation2 + $0xf8] sm:$0xf0]  ;;  %v2570_v50 = vld [vmem:[#allocation2 + $0x208] sm:$0xf] }
  0x77   :  { %v2524_v31 = vld [vmem:[#allocation2 + $0x1b8] sm:$0xf0]  ;;  %v2954_v13 = vld [vmem:[#allocation2 + $0x508] sm:$0xf] }
  0x78   :  { %1446 = vmatpush.bf16.msrb.mxu3 %v2507_v52  ;;  %3089 = vmatmul.msk.bf16.vlgmr.msrb.gmra.mxu0 %vm1244_vm0, %v3823_v45  ;;  %v3479_v52 = vld [vmem:[#allocation2 + $0x214] sm:$0xf0]  ;;  %v2527_v40 = vor.u32 %v3465_v29, %v2524_v31  ;;  %v2668_v31 = vld [vmem:[#allocation2 + $0x2d8] sm:$0xf0] }
  0x79   :  { %1471 = vmatpush.bf16.msra.mxu2 %v2779_v44  ;;  %1459 = vmatpush.bf16.msra.mxu0 %v2635_v1  ;;  %v3441_v44 = vld [vmem:[#allocation2 + $0xec] sm:$0xf]  ;;  %v2571_v63 = vor.u32 %v3479_v52, %v2570_v50  ;;  %v2923_v1 = vor.u32 %v3567_v54, %v2922_v49  ;;  %v2986_v49 = vld [vmem:[#allocation2 + $0x548] sm:$0xf]  ;;  %v3583_v50 = vld [vmem:[#allocation2 + $0x554] sm:$0xf0]  ;;  %v2367_v52 = vor.u32 %v3425_v39, %v2364_v42 }
  0x7a   :  { %1434 = vmatpush.bf16.msrb.mxu1 %v2363_v61  ;;  %v3599_v61 = vld [vmem:[#allocation2 + $0x5d4] sm:$0xf0]  ;;  %v2431_v62 = vor.u32 %v3441_v44, %v2428_v46  ;;  %v2508_v44 = vld [vmem:[#allocation2 + $0x198] sm:$0xf0]  ;;  %v3565_v39 = vld [vmem:[#allocation2 + $0x4cc] sm:$0xf] }
  0x7b   :  { %v2924_v42 = vld [vmem:[#allocation2 + $0x4d8] sm:$0xf0] }
  0x7c   :  { %1447 = vmatpush.bf16.msrb.mxu3 %v2491_v2  ;;  %v2412_v2 = vld [vmem:[#allocation2 + $0xd8] sm:$0xf0] }
  0x7d   :  { %1472 = vmatpush.bf16.msra.mxu2 %v2763_v60  ;;  %1460 = vmatpush.bf16.msra.mxu0 %v2619_v14  ;;  %v3050_v60 = vld [vmem:[#allocation2 + $0x5c8] sm:$0xf]  ;;  %v2415_v12 = vor.u32 %v3437_v0, %v2412_v2  ;;  %v2559_v14 = vor.u32 %v3473_v5, %v2556_v6 }
  0x7e   :  { %1435 = vmatpush.bf16.msrb.mxu1 %v2347_v10  ;;  %v3051_v7 = vor.u32 %v3599_v61, %v3050_v60  ;;  %v3034_v10 = vld [vmem:[#allocation2 + $0x5a8] sm:$0xf]  ;;  %v2492_v60 = vld [vmem:[#allocation2 + $0x178] sm:$0xf0]  ;;  %v2987_v61 = vor.u32 %v3583_v50, %v2986_v49 }
  0x7f   :  { %v3035_v19 = vor.u32 %v3595_v11, %v3034_v10  ;;  %v2970_v0 = vld [vmem:[#allocation2 + $0x528] sm:$0xf]  ;;  %v2444_v49 = vld [vmem:[#allocation2 + $0x118] sm:$0xf0] }
  0x80   :  { %1448 = vmatpush.bf16.msrb.mxu3 %v2475_v15  ;;  %v2826_v11 = vld [vmem:[#allocation2 + $0x408] sm:$0xf]  ;;  %v2780_v50 = vld [vmem:[#allocation2 + $0x3b8] sm:$0xf0] }
  0x81   :  { %1473 = vmatpush.bf16.msra.mxu2 %v2747_v9  ;;  %1461 = vmatpush.bf16.msra.mxu0 %v2603_v27  ;;  %v3563_v9 = vld [vmem:[#allocation2 + $0x4b4] sm:$0xf0] }
  0x82   :  { %1436 = vmatpush.bf16.msrb.mxu1 %v2331_v23  ;;  %v2907_v15 = vor.u32 %v3563_v9, %v2906_v8  ;;  %v3591_v23 = vld [vmem:[#allocation2 + $0x594] sm:$0xf0]  ;;  %v3453_v8 = vld [vmem:[#allocation2 + $0x14c] sm:$0xf]  ;;  %v2476_v9 = vld [vmem:[#allocation2 + $0x158] sm:$0xf0] }
  0x83   :  { %v3019_v32 = vor.u32 %v3591_v23, %v3018_v22  ;;  %v3413_v22 = vld [vmem:[#allocation2 + $0xc] sm:$0xf]  ;;  %v2316_v23 = vld [vmem:[#allocation2 + $0x18] sm:$0xf0] }
  0x84   :  { %1449 = vmatpush.bf16.msrb.mxu3 %v2459_v28  ;;  %v2380_v28 = vld [vmem:[#allocation2 + $0x98] sm:$0xf0] }
  0x85   :  { %1474 = vmatpush.bf16.msra.mxu2 %v2731_v21  ;;  %1462 = vmatpush.bf16.msra.mxu0 %v2587_v43  ;;  %v3559_v21 = vld [vmem:[#allocation2 + $0x494] sm:$0xf0]  ;;  %v2383_v38 = vor.u32 %v3429_v25, %v2380_v28  ;;  %v3461_v43 = vld [vmem:[#allocation2 + $0x18c] sm:$0xf] }
  0x86   :  { %1437 = vmatpush.bf16.msrb.mxu1 %v2315_v41  ;;  %v2891_v27 = vor.u32 %v3559_v21, %v2890_v20  ;;  %v2875_v41 = vor.u32 %v3555_v34, %v2874_v33  ;;  %v2511_v54 = vor.u32 %v3461_v43, %v2508_v44  ;;  %v2479_v20 = vor.u32 %v3453_v8, %v2476_v9  ;;  %v3501_v28 = vld [vmem:[#allocation2 + $0x2cc] sm:$0xf]  ;;  %v2460_v33 = vld [vmem:[#allocation2 + $0x138] sm:$0xf0] }
  0x87   :  { %v2319_v34 = vor.u32 %v3413_v22, %v2316_v23  ;;  %v3497_v43 = vld [vmem:[#allocation2 + $0x2ac] sm:$0xf]  ;;  %v2652_v44 = vld [vmem:[#allocation2 + $0x2b8] sm:$0xf0] }
  0x88   :  { %1450 = vmatpush.bf16.msrb.mxu3 %v2443_v47  ;;  %v2858_v47 = vld [vmem:[#allocation2 + $0x448] sm:$0xf]  ;;  %v3557_v8 = vld [vmem:[#allocation2 + $0x48c] sm:$0xf]  ;;  %v2892_v9 = vld [vmem:[#allocation2 + $0x498] sm:$0xf0] }
  0x89   :  { %1475 = vmatpush.bf16.msra.mxu2 %v2715_v37  ;;  %1438 = vmatmul.bf16.vlgmr.msrb.gmra.mxu1 %v3807_v55  ;;  %v3587_v37 = vld [vmem:[#allocation2 + $0x574] sm:$0xf0] }
  0x8a   :  { %1482 = vmatpush.bf16.msra.mxu1 %v2939_v48  ;;  %1463 = vmatpush.bf16.msra.mxu0 %v2571_v63  ;;  %v3003_v46 = vor.u32 %v3587_v37, %v3002_v36  ;;  %v3551_v48 = vld [vmem:[#allocation2 + $0x454] sm:$0xf0]  ;;  %v3533_v36 = vld [vmem:[#allocation2 + $0x3cc] sm:$0xf]  ;;  %v2796_v37 = vld [vmem:[#allocation2 + $0x3d8] sm:$0xf0] }
  0x8b   :  { %1451 = vmatmul.bf16.vlgmr.msrb.gmra.mxu3 %v3816_v4  ;;  %v2859_v56 = vor.u32 %v3551_v48, %v2858_v47  ;;  %v3547_v63 = vld [vmem:[#allocation2 + $0x434] sm:$0xf0]  ;;  %v3529_v47 = vld [vmem:[#allocation2 + $0x3ac] sm:$0xf] }
  0x8c   :  { %1495 = vmatpush.bf16.msra.mxu3 %v3067_v53  ;;  %v3421_v53 = vld [vmem:[#allocation2 + $0x4c] sm:$0xf] }
  0x8d   :  { %1476 = vmatpush.bf16.msra.mxu2 %v2699_v59  ;;  %1464 = vmatmul.bf16.vlgmr.msra.gmra.mxu0 %v3805_v51  ;;  %v3457_v59 = vld [vmem:[#allocation2 + $0x16c] sm:$0xf]  ;;  %v2351_v2 = vor.u32 %v3421_v53, %v2348_v58  ;;  %v3068_v53 = vld [vmem:[#allocation2 + $0x5f8] sm:$0xf0] }
  0x8e   :  { %1483 = vmatpush.bf16.msra.mxu1 %v2923_v1  ;;  %1515 = vmatpush.bf16.msrb.mxu0 %v3083_v3  ;;  %v3579_v1 = vld [vmem:[#allocation2 + $0x534] sm:$0xf0]  ;;  %v3417_v3 = vld [vmem:[#allocation2 + $0x2c] sm:$0xf]  ;;  %v2495_v5 = vor.u32 %v3457_v59, %v2492_v60  ;;  %v2908_v60 = vld [vmem:[#allocation2 + $0x4b8] sm:$0xf0] }
  0x8f   :  { %v2971_v10 = vor.u32 %v3579_v1, %v2970_v0  ;;  %v3445_v48 = vld [vmem:[#allocation2 + $0x10c] sm:$0xf]  ;;  %v2636_v0 = vld [vmem:[#allocation2 + $0x298] sm:$0xf0] }
  0x90   :  { %1496 = vmatpush.bf16.msra.mxu3 %v3051_v7  ;;  %1477 = vmatmul.bf16.vlgmr.msra.gmra.mxu2 %v3809_v57  ;;  %v2332_v7 = vld [vmem:[#allocation2 + $0x38] sm:$0xf0]  ;;  %v2447_v58 = vor.u32 %v3445_v48, %v2444_v49  ;;  %v3561_v59 = vld [vmem:[#allocation2 + $0x4ac] sm:$0xf]  ;;  %v3868_v49 = vld [vmem:[%s4331_s2] sm:$0xf] }
  0x91   :  { %1521 = vmatpush.bf16.msrb.mxu2 %v2431_v62  ;;  %v2842_v62 = vld [vmem:[#allocation2 + $0x428] sm:$0xf]  ;;  %v2335_v17 = vor.u32 %v3417_v3, %v2332_v7  ;;  %v3525_v1 = vld [vmem:[#allocation2 + $0x38c] sm:$0xf] }
  0x92   :  { %1534 = vmatpush.bf16.msra.mxu0 %v2559_v14  ;;  %1484 = vmatpush.bf16.msra.mxu1 %v2907_v15  ;;  %v2843_v6 = vor.u32 %v3547_v63, %v2842_v62  ;;  %v3575_v14 = vld [vmem:[#allocation2 + $0x514] sm:$0xf0]  ;;  %v3505_v15 = vld [vmem:[#allocation2 + $0x2ec] sm:$0xf] }
  0x93   :  { %v2687_v25 = vor.u32 %v3505_v15, %v2684_v16  ;;  %v3493_v63 = vld [vmem:[#allocation2 + $0x28c] sm:$0xf]  ;;  %v2748_v15 = vld [vmem:[#allocation2 + $0x378] sm:$0xf0] }
  0x94   :  { %1497 = vmatpush.bf16.msra.mxu3 %v3035_v19  ;;  %v2812_v19 = vld [vmem:[#allocation2 + $0x3f8] sm:$0xf0]  ;;  %v3597_v3 = vld [vmem:[#allocation2 + $0x5cc] sm:$0xf]  ;;  %v2639_v7 = vor.u32 %v3493_v63, %v2636_v0 }
  0x95   :  { %1522 = vmatpush.bf16.msrb.mxu2 %v2415_v12  ;;  %v3543_v12 = vld [vmem:[#allocation2 + $0x414] sm:$0xf0]  ;;  %v2815_v29 = vor.u32 %v3537_v18, %v2812_v19  ;;  %v3593_v16 = vld [vmem:[#allocation2 + $0x5ac] sm:$0xf]  ;;  %v2895_v18 = vor.u32 %v3557_v8, %v2892_v9  ;;  %v2988_v0 = vld [vmem:[#allocation2 + $0x558] sm:$0xf0] }
  0x96   :  { %1535 = vmatpush.bf16.msra.mxu0 %v2543_v26  ;;  %1485 = vmatpush.bf16.msra.mxu1 %v2891_v27  ;;  %v2827_v21 = vor.u32 %v3543_v12, %v2826_v11  ;;  %v3569_v26 = vld [vmem:[#allocation2 + $0x4ec] sm:$0xf]  ;;  %v2940_v27 = vld [vmem:[#allocation2 + $0x4f8] sm:$0xf0] }
  0x97   :  { %v3489_v12 = vld [vmem:[#allocation2 + $0x26c] sm:$0xf] }
  0x98   :  { %1498 = vmatpush.bf16.msra.mxu3 %v3019_v32  ;;  %v3449_v32 = vld [vmem:[#allocation2 + $0x12c] sm:$0xf] }
  0x99   :  { %1523 = vmatpush.bf16.msrb.mxu2 %v2399_v24  ;;  %v2955_v24 = vor.u32 %v3575_v14, %v2954_v13  ;;  %v3521_v13 = vld [vmem:[#allocation2 + $0x36c] sm:$0xf] }
  0x9a   :  { %1536 = vmatpush.bf16.msra.mxu0 %v2527_v40  ;;  %1486 = vmatpush.bf16.msra.mxu1 %v2875_v41  ;;  %v2671_v40 = vor.u32 %v3501_v28, %v2668_v31  ;;  %v2463_v41 = vor.u32 %v3449_v32, %v2460_v33  ;;  %v2751_v22 = vor.u32 %v3521_v13, %v2748_v15  ;;  %v2732_v28 = vld [vmem:[#allocation2 + $0x358] sm:$0xf0]  ;;  %v3581_v63 = vld [vmem:[#allocation2 + $0x54c] sm:$0xf] }
  0x9b   :  { %v3020_v31 = vld [vmem:[#allocation2 + $0x598] sm:$0xf0]  ;;  %v3541_v9 = vld [vmem:[#allocation2 + $0x40c] sm:$0xf] }
  0x9c   :  { %1499 = vmatpush.bf16.msra.mxu3 %v3003_v46  ;;  %v2799_v46 = vor.u32 %v3533_v36, %v2796_v37  ;;  %v2860_v36 = vld [vmem:[#allocation2 + $0x458] sm:$0xf0]  ;;  %v3605_v13 = vld [vmem:[#allocation2 + $0x60c] sm:$0xf] }
  0x9d   :  { %1524 = vmatpush.bf16.msrb.mxu2 %v2383_v38  ;;  %3090 = vmatmul.msk.bf16.vlgmr.msrb.gmra.mxu0 %vm1244_vm0, %v3823_v45  ;;  %v2943_v38 = vor.u32 %v3569_v26, %v2940_v27  ;;  %v3517_v26 = vld [vmem:[#allocation2 + $0x34c] sm:$0xf]  ;;  %v3084_v15 = vld [vmem:[#allocation2 + $0x618] sm:$0xf0] }
  0x9e   :  { %1537 = vmatpush.bf16.msra.mxu0 %v2511_v54  ;;  %1487 = vmatpush.bf16.msra.mxu1 %v2859_v56  ;;  %v2927_v54 = vor.u32 %v3565_v39, %v2924_v42  ;;  %v2655_v56 = vor.u32 %v3497_v43, %v2652_v44  ;;  %v3513_v42 = vld [vmem:[#allocation2 + $0x32c] sm:$0xf]  ;;  %v2716_v43 = vld [vmem:[#allocation2 + $0x338] sm:$0xf0] }
  0x9f   :  { %v3585_v44 = vld [vmem:[#allocation2 + $0x56c] sm:$0xf] }
  0xa0   :  { %1500 = vmatpush.bf16.msra.mxu3 %v2987_v61  ;;  %v2783_v61 = vor.u32 %v3529_v47, %v2780_v50 }
  0xa1   :  { %1525 = vmatpush.bf16.msrb.mxu2 %v2367_v52  ;;  %v3601_v52 = vld [vmem:[#allocation2 + $0x5ec] sm:$0xf] }
  0xa2   :  { %1538 = vmatpush.bf16.msra.mxu0 %v2495_v5  ;;  %1488 = vmatpush.bf16.msra.mxu1 %v2843_v6  ;;  %v3071_v62 = vor.u32 %v3601_v52, %v3068_v53  ;;  %v3052_v5 = vld [vmem:[#allocation2 + $0x5d8] sm:$0xf0]  ;;  %v2911_v6 = vor.u32 %v3561_v59, %v2908_v60  ;;  %v3545_v52 = vld [vmem:[#allocation2 + $0x42c] sm:$0xf] }
  0xa3   :  { %v3055_v11 = vor.u32 %v3597_v3, %v3052_v5  ;;  %v2844_v53 = vld [vmem:[#allocation2 + $0x438] sm:$0xf0]  ;;  %v3509_v60 = vld [vmem:[#allocation2 + $0x30c] sm:$0xf]  ;;  %v3623_v3 = vld [vmem:[%s4332_s3 + $0x74] sm:$0xf0] }
  0xa4   :  { %1501 = vmatpush.bf16.msra.mxu3 %v2971_v10  ;;  %v2572_v59 = vld [vmem:[#allocation2 + $0x218] sm:$0xf0]  ;;  %v3214_v5 = vld [vmem:[%s4332_s3 + $0xf0] sm:$0xf] }
  0xa5   :  { %1526 = vmatpush.bf16.msrb.mxu2 %v2351_v2  ;;  %v2764_v2 = vld [vmem:[#allocation2 + $0x398] sm:$0xf0] }
  0xa6   :  { %1539 = vmatpush.bf16.msra.mxu0 %v2479_v20  ;;  %1489 = vmatpush.bf16.msra.mxu1 %v2827_v21  ;;  %v2767_v10 = vor.u32 %v3525_v1, %v2764_v2  ;;  %v3553_v20 = vld [vmem:[#allocation2 + $0x46c] sm:$0xf]  ;;  %v2876_v21 = vld [vmem:[#allocation2 + $0x478] sm:$0xf0]  ;;  %v3859_v27 = vpop.f32.mrf.mxu1  ;;  %v2847_v2 = vor.u32 %v3545_v52, %v2844_v53  ;;  %v3615_v52 = vld [vmem:[%s4332_s3 + $0x34] sm:$0xf0] }
  0xa7   :  { %v2879_v32 = vor.u32 %v3553_v20, %v2876_v21 }
  0xa8   :  { %1502 = vmatpush.bf16.msra.mxu3 %v2955_v24  ;;  %v3485_v24 = vld [vmem:[#allocation2 + $0x24c] sm:$0xf] }
  0xa9   :  { %1527 = vmatpush.bf16.msrb.mxu2 %v2335_v17  ;;  %1490 = vmatmul.bf16.vlgmr.msra.gmra.mxu1 %v3833_v30  ;;  %v3856_v14 = vpop.f32.mrf.mxu0  ;;  %v3036_v17 = vld [vmem:[#allocation2 + $0x5b8] sm:$0xf0] }
  0xaa   :  { %1547 = vmatpush.bf16.msrb.mxu1 %v2687_v25  ;;  %1540 = vmatpush.bf16.msra.mxu0 %v2463_v41  ;;  %v3039_v23 = vor.u32 %v3593_v16, %v3036_v17  ;;  %v2604_v25 = vld [vmem:[#allocation2 + $0x258] sm:$0xf0] }
  0xab   :  { %1503 = vmatmul.bf16.vlgmr.msra.gmra.mxu3 %v3835_v35  ;;  %v2607_v33 = vor.u32 %v3485_v24, %v2604_v25  ;;  %v2588_v41 = vld [vmem:[#allocation2 + $0x238] sm:$0xf0]  ;;  %v3087_v24 = vor.u32 %v3605_v13, %v3084_v15  ;;  %v3206_v25 = vld [vmem:[%s4332_s3 + $0xe0] sm:$0xf] }
  0xac   :  { %1560 = vmatpush.bf16.msrb.mxu3 %v2815_v29  ;;  %v3589_v29 = vld [vmem:[#allocation2 + $0x58c] sm:$0xf]  ;;  %v3094_v15 = vld [vmem:[%s4332_s3] sm:$0xf] }
  0xad   :  { %1528 = vmatpush.bf16.msrb.mxu2 %v2319_v34  ;;  %v3549_v34 = vld [vmem:[#allocation2 + $0x44c] sm:$0xf]  ;;  %v3023_v39 = vor.u32 %v3589_v29, %v3020_v31 }
  0xae   :  { %1548 = vmatpush.bf16.msrb.mxu1 %v2671_v40  ;;  %1541 = vmatpush.bf16.msra.mxu0 %v2447_v58  ;;  %v3863_v37 = vpop.f32.mrf.mxu3  ;;  %v3481_v40 = vld [vmem:[#allocation2 + $0x22c] sm:$0xf]  ;;  %v2863_v48 = vor.u32 %v3549_v34, %v2860_v36  ;;  %v1272_v1 = vpop.f32.mrf.mxu1  ;;  %v3134_v34 = vld [vmem:[%s4332_s3 + $0x50] sm:$0xf]  ;;  %v3619_v36 = vld [vmem:[%s4332_s3 + $0x54] sm:$0xf0] }
  0xaf   :  { %v2591_v50 = vor.u32 %v3481_v40, %v2588_v41 }
  0xb0   :  { %1561 = vmatpush.bf16.msrb.mxu3 %v2799_v46  ;;  %1529 = vmatmul.bf16.vlgmr.msrb.gmra.mxu2 %v3807_v55  ;;  %v2620_v55 = vld [vmem:[#allocation2 + $0x278] sm:$0xf0] }
  0xb1   :  { %1573 = vmatpush.bf16.msra.mxu2 %v2943_v38  ;;  %1542 = vmatmul.bf16.vlgmr.msra.gmra.mxu0 %v3816_v4  ;;  %v2623_v19 = vor.u32 %v3489_v12, %v2620_v55  ;;  %v3861_v4 = vpop.f32.mrf.mxu2  ;;  %v2735_v38 = vor.u32 %v3517_v26, %v2732_v28  ;;  %v3004_v46 = vld [vmem:[#allocation2 + $0x578] sm:$0xf0]  ;;  %v1259_v47 = vpop.f32.mrf.mxu0  ;;  %v2991_v55 = vor.u32 %v3581_v63, %v2988_v0  ;;  %v3637_v26 = vld [vmem:[%s4332_s3 + $0xe4] sm:$0xf0]  ;;  %v3174_v0 = vld [vmem:[%s4332_s3 + $0xa0] sm:$0xf] }
  0xb2   :  { %1549 = vmatpush.bf16.msrb.mxu1 %v2655_v56  ;;  %1586 = vmatpush.bf16.msrb.mxu0 %v3071_v62  ;;  %v2719_v56 = vor.u32 %v3513_v42, %v2716_v43  ;;  %v3007_v58 = vor.u32 %v3585_v44, %v3004_v46  ;;  %v3150_v62 = vld [vmem:[%s4332_s3 + $0x70] sm:$0xf]  ;;  %v3135_v42 = vor.u32 %v3619_v36, %v3134_v34  ;;  %v3617_v43 = vld [vmem:[%s4332_s3 + $0x44] sm:$0xf0]  ;;  %v3636_v34 = vld [vmem:[%s4332_s3 + $0xe4] sm:$0xf] }
  0xb3   :  { %v3151_v17 = vor.u32 %v3623_v3, %v3150_v62  ;;  %v3633_v46 = vld [vmem:[%s4332_s3 + $0xc4] sm:$0xf0]  ;;  %v3110_v62 = vld [vmem:[%s4332_s3 + $0x20] sm:$0xf]  ;;  %v3102_v3 = vld [vmem:[%s4332_s3 + $0x10] sm:$0xf] }
  0xb4   :  { %1562 = vmatpush.bf16.msrb.mxu3 %v2783_v61  ;;  %v2700_v61 = vld [vmem:[#allocation2 + $0x318] sm:$0xf0]  ;;  %v3208_v36 = vld [vmem:[%s4332_s3 + $0xe8] sm:$0xf0] }
  0xb5   :  { %1574 = vmatpush.bf16.msra.mxu2 %v2927_v54  ;;  %v3477_v54 = vld [vmem:[#allocation2 + $0x20c] sm:$0xf]  ;;  %v2703_v12 = vor.u32 %v3509_v60, %v2700_v61 }
  0xb6   :  { %1550 = vmatpush.bf16.msrb.mxu1 %v2639_v7  ;;  %1587 = vmatpush.bf16.msrb.mxu0 %v3055_v11  ;;  %v2575_v8 = vor.u32 %v3477_v54, %v2572_v59  ;;  %v256_v11 = vperm.slane %v3868_v49, 0  ;;  %v1298_v16 = vpop.f32.mrf.mxu3 }
  0xb7   :  { %v3609_v16 = vld [vmem:[%s4332_s3 + $0x4] sm:$0xf0] }
  0xb8   :  { %1563 = vmatpush.bf16.msrb.mxu3 %v2767_v10  ;;  %v2828_v10 = vld [vmem:[#allocation2 + $0x418] sm:$0xf0]  ;;  %v1258_v28 = vadd.f32 %v3856_v14, %v256_v11  ;;  %v3207_v14 = vor.u32 %v3637_v26, %v3206_v25  ;;  %v3627_v11 = vld [vmem:[%s4332_s3 + $0x94] sm:$0xf0] }
  0xb9   :  { %1575 = vmatpush.bf16.msra.mxu2 %v2911_v6  ;;  %v3639_v6 = vld [vmem:[%s4332_s3 + $0xf4] sm:$0xf0]  ;;  %v1285_v7 = vpop.f32.mrf.mxu2  ;;  %v2831_v21 = vor.u32 %v3541_v9, %v2828_v10  ;;  %v3166_v10 = vld [vmem:[%s4332_s3 + $0x90] sm:$0xf] }
  0xba   :  { %1551 = vmatpush.bf16.msrb.mxu1 %v2623_v19  ;;  %1588 = vmatpush.bf16.msrb.mxu0 %v3039_v23  ;;  %v2972_v19 = vld [vmem:[#allocation2 + $0x538] sm:$0xf0]  ;;  %v3215_v20 = vor.u32 %v3639_v6, %v3214_v5  ;;  %v3621_v23 = vld [vmem:[%s4332_s3 + $0x64] sm:$0xf0]  ;;  %v1271_v40 = vadd.f32 %v3859_v27, %v1258_v28  ;;  %v3190_v27 = vld [vmem:[%s4332_s3 + $0xc0] sm:$0xf] }
  0xbb   :  { %v3191_v53 = vor.u32 %v3633_v46, %v3190_v27  ;;  %v3611_v5 = vld [vmem:[%s4332_s3 + $0x14] sm:$0xf0] }
  0xbc   :  { %1564 = vmatpush.bf16.msrb.mxu3 %v2751_v22  ;;  %v3142_v22 = vld [vmem:[%s4332_s3 + $0x60] sm:$0xf] }
  0xbd   :  { %1576 = vmatpush.bf16.msra.mxu2 %v2895_v18  ;;  %v3577_v18 = vld [vmem:[#allocation2 + $0x52c] sm:$0xf]  ;;  %v3143_v31 = vor.u32 %v3621_v23, %v3142_v22  ;;  %v3216_v22 = vld [vmem:[%s4332_s3 + $0xf8] sm:$0xf0]  ;;  %v3095_v23 = vor.u32 %v3609_v16, %v3094_v15 }
  0xbe   :  { %1552 = vmatpush.bf16.msrb.mxu1 %v2607_v33  ;;  %1589 = vmatpush.bf16.msrb.mxu0 %v3023_v39  ;;  %v2975_v29 = vor.u32 %v3577_v18, %v2972_v19  ;;  %v2956_v33 = vld [vmem:[#allocation2 + $0x518] sm:$0xf0]  ;;  %v3198_v39 = vld [vmem:[%s4332_s3 + $0xd0] sm:$0xf]  ;;  %v3167_v18 = vor.u32 %v3627_v11, %v3166_v10  ;;  %v3158_v19 = vld [vmem:[%s4332_s3 + $0x80] sm:$0xf] }
  0xbf   :  { %v3628_v10 = vld [vmem:[%s4332_s3 + $0xa4] sm:$0xf]  ;;  %v3176_v11 = vld [vmem:[%s4332_s3 + $0xa8] sm:$0xf0]  ;;  %v3104_v15 = vld [vmem:[%s4332_s3 + $0x18] sm:$0xf0] }
  0xc0   :  { %1565 = vmatpush.bf16.msrb.mxu3 %v2735_v38 }
  0xc1   :  { %1577 = vmatpush.bf16.msra.mxu2 %v2879_v32  ;;  %v3573_v32 = vld [vmem:[#allocation2 + $0x50c] sm:$0xf]  ;;  %v1335_v38 = vpop.f32.mrf.mxu2 }
  0xc2   :  { %1553 = vmatpush.bf16.msrb.mxu1 %v2591_v50  ;;  %1590 = vmatpush.bf16.msrb.mxu0 %v3007_v58  ;;  %v2959_v41 = vor.u32 %v3573_v32, %v2956_v33  ;;  %v3118_v50 = vld [vmem:[%s4332_s3 + $0x30] sm:$0xf]  ;;  %v3631_v58 = vld [vmem:[%s4332_s3 + $0xb4] sm:$0xf0] }
  0xc3   :  { %v3119_v60 = vor.u32 %v3615_v52, %v3118_v50  ;;  %v3616_v50 = vld [vmem:[%s4332_s3 + $0x44] sm:$0xf]  ;;  %v3128_v52 = vld [vmem:[%s4332_s3 + $0x48] sm:$0xf0] }
  0xc4   :  { %1566 = vmatpush.bf16.msrb.mxu3 %v2719_v56 }
  0xc5   :  { %1578 = vmatpush.bf16.msra.mxu2 %v2863_v48  ;;  %v1309_v48 = vpop.f32.mrf.mxu0 }
  0xc6   :  { %1554 = vmatpush.bf16.msrb.mxu1 %v2575_v8  ;;  %1591 = vmatpush.bf16.msrb.mxu0 %v2991_v55  ;;  %v3103_v55 = vor.u32 %v3611_v5, %v3102_v3 }
  0xc8   :  { %1567 = vmatpush.bf16.msrb.mxu3 %v2703_v12  ;;  %v1322_v54 = vpop.f32.mrf.mxu1 }
  0xc9   :  { %1579 = vmatpush.bf16.msra.mxu2 %v2847_v2  ;;  %1555 = vmatmul.bf16.vlgmr.msrb.gmra.mxu1 %v3805_v51  ;;  %v3635_v51 = vld [vmem:[%s4332_s3 + $0xd4] sm:$0xf0]  ;;  %v1337_v56 = vpop.f32.mrf.mxu2 }
  0xca   :  { %2023 = vmatpush.bf16.msra.mxu1 %v3215_v20  ;;  %1592 = vmatpush.bf16.msrb.mxu0 %v2975_v29  ;;  %v3199_v44 = vor.u32 %v3635_v51, %v3198_v39  ;;  %v3625_v20 = vld [vmem:[%s4332_s3 + $0x84] sm:$0xf0]  ;;  %v3620_v29 = vld [vmem:[%s4332_s3 + $0x64] sm:$0xf]  ;;  %v3618_v51 = vld [vmem:[%s4332_s3 + $0x54] sm:$0xf] }
  0xcb   :  { %1568 = vmatmul.bf16.vlgmr.msrb.gmra.mxu3 %v3809_v57  ;;  %v3126_v57 = vld [vmem:[%s4332_s3 + $0x40] sm:$0xf]  ;;  %v3159_v28 = vor.u32 %v3625_v20, %v3158_v19  ;;  %v3649_v19 = vld [vmem:[%s4332_s3 + $0x144] sm:$0xf0] }
  0xcc   :  { %2010 = vmatpush.bf16.msra.mxu3 %v3151_v17  ;;  %v3127_v47 = vor.u32 %v3617_v43, %v3126_v57  ;;  %v3622_v17 = vld [vmem:[%s4332_s3 + $0x74] sm:$0xf]  ;;  %v3200_v43 = vld [vmem:[%s4332_s3 + $0xd8] sm:$0xf0] }
  0xcd   :  { %1580 = vmatpush.bf16.msra.mxu2 %v2831_v21  ;;  %v1311_v6 = vpop.f32.mrf.mxu0  ;;  %v3638_v21 = vld [vmem:[%s4332_s3 + $0xf4] sm:$0xf] }
  0xce   :  { %2024 = vmatpush.bf16.msra.mxu1 %v3207_v14  ;;  %1593 = vmatpush.bf16.msrb.mxu0 %v2959_v41  ;;  %v1348_v7 = vpop.f32.mrf.mxu3  ;;  %v3219_v32 = vor.u32 %v3638_v21, %v3216_v22  ;;  %v257_v14 = vperm.slane %v3868_v49, 1  ;;  %v3211_v41 = vor.u32 %v3636_v34, %v3208_v36  ;;  %v3634_v57 = vld [vmem:[%s4332_s3 + $0xd4] sm:$0xf]  ;;  %v3612_v6 = vld [vmem:[%s4332_s3 + $0x24] sm:$0xf] }
  0xcf   :  { %v3168_v21 = vld [vmem:[%s4332_s3 + $0x98] sm:$0xf0]  ;;  %v3238_v34 = vld [vmem:[%s4332_s3 + $0x120] sm:$0xf]  ;;  %v3645_v36 = vld [vmem:[%s4332_s3 + $0x124] sm:$0xf0] }
  0xd0   :  { %2011 = vmatpush.bf16.msra.mxu3 %v3143_v31  ;;  %1581 = vmatmul.bf16.vlgmr.msra.gmra.mxu2 %v3833_v30  ;;  %v1284_v30 = vadd.f32 %v3861_v4, %v1271_v40  ;;  %v3182_v4 = vld [vmem:[%s4332_s3 + $0xb0] sm:$0xf]  ;;  %v1324_v9 = vpop.f32.mrf.mxu1  ;;  %v3144_v31 = vld [vmem:[%s4332_s3 + $0x68] sm:$0xf0]  ;;  %v3136_v40 = vld [vmem:[%s4332_s3 + $0x58] sm:$0xf0]  ;;  %v1349_v27 = vadd.f32 %v1348_v7, %v257_v14 }
  0xd1   :  { %1606 = vmatpush.bf16.msrb.mxu2 %v3087_v24  ;;  %1594 = vmatmul.bf16.vlgmr.msrb.gmra.mxu0 %v3835_v35  ;;  %v3613_v35 = vld [vmem:[%s4332_s3 + $0x24] sm:$0xf0]  ;;  %v3183_v63 = vor.u32 %v3631_v58, %v3182_v4  ;;  %v3147_v39 = vor.u32 %v3620_v29, %v3144_v31  ;;  %v3192_v4 = vld [vmem:[%s4332_s3 + $0xc8] sm:$0xf0]  ;;  %v3262_v58 = vld [vmem:[%s4332_s3 + $0x150] sm:$0xf] }
  0xd2   :  { %2025 = vmatpush.bf16.msra.mxu1 %v3199_v44  ;;  %v1297_v59 = vadd.f32 %v3863_v37, %v1284_v30  ;;  %v3629_v37 = vld [vmem:[%s4332_s3 + $0xa4] sm:$0xf0]  ;;  %v3111_v1 = vor.u32 %v3613_v35, %v3110_v62  ;;  %v3655_v44 = vld [vmem:[%s4332_s3 + $0x174] sm:$0xf0]  ;;  %v3270_v30 = vld [vmem:[%s4332_s3 + $0x160] sm:$0xf] }
  0xd3   :  { %v3175_v8 = vor.u32 %v3629_v37, %v3174_v0  ;;  %v1361_v12 = vpop.f32.mrf.mxu2  ;;  %v3614_v62 = vld [vmem:[%s4332_s3 + $0x34] sm:$0xf]  ;;  %v3120_v35 = vld [vmem:[%s4332_s3 + $0x38] sm:$0xf0]  ;;  %v3112_v7 = vld [vmem:[%s4332_s3 + $0x28] sm:$0xf0] }
  0xd4   :  { %2012 = vmatpush.bf16.msra.mxu3 %v3135_v42  ;;  %v1310_v61 = vadd.f32 %v1309_v48, %v1297_v59  ;;  %v3278_v42 = vld [vmem:[%s4332_s3 + $0x170] sm:$0xf]  ;;  %v3139_v48 = vor.u32 %v3618_v51, %v3136_v40  ;;  %v3651_v59 = vld [vmem:[%s4332_s3 + $0x154] sm:$0xf0]  ;;  %v3123_v5 = vor.u32 %v3614_v62, %v3120_v35  ;;  %v3608_v29 = vld [vmem:[%s4332_s3 + $0x4] sm:$0xf] }
  0xd5   :  { %v3279_v46 = vor.u32 %v3655_v44, %v3278_v42  ;;  %v3263_v0 = vor.u32 %v3651_v59, %v3262_v58  ;;  %v3160_v51 = vld [vmem:[%s4332_s3 + $0x88] sm:$0xf0]  ;;  %v3239_v42 = vor.u32 %v3645_v36, %v3238_v34  ;;  %v3230_v44 = vld [vmem:[%s4332_s3 + $0x110] sm:$0xf]  ;;  %v3654_v58 = vld [vmem:[%s4332_s3 + $0x174] sm:$0xf] }
  0xd6   :  { %2026 = vmatpush.bf16.msra.mxu1 %v3191_v53  ;;  %v1323_v2 = vadd.f32 %v1322_v54, %v1310_v61  ;;  %v1350_v26 = vpop.f32.mrf.mxu3  ;;  %v3203_v53 = vor.u32 %v3634_v57, %v3200_v43  ;;  %v3632_v54 = vld [vmem:[%s4332_s3 + $0xc4] sm:$0xf]  ;;  %v3131_v61 = vor.u32 %v3616_v50, %v3128_v52  ;;  %v3222_v52 = vld [vmem:[%s4332_s3 + $0x100] sm:$0xf]  ;;  %v3280_v59 = vld [vmem:[%s4332_s3 + $0x178] sm:$0xf0] }
  0xd7   :  { %2036 = vmatpush.bf16.msra.mxu2 %v3279_v46 }
  0xd8   :  { %2013 = vmatpush.bf16.msra.mxu3 %v3127_v47  ;;  %v1336_v13 = vadd.f32 %v1335_v38, %v1323_v2  ;;  %v3653_v47 = vld [vmem:[%s4332_s3 + $0x164] sm:$0xf0]  ;;  %v3184_v2 = vld [vmem:[%s4332_s3 + $0xb8] sm:$0xf0] }
  0xd9   :  { %v3271_v56 = vor.u32 %v3653_v47, %v3270_v30 }
  0xda   :  { %2027 = vmatpush.bf16.msra.mxu1 %v3183_v63  ;;  %v1612_v24 = vmax.f32 %v1336_v13, 0.0  ;;  %v3195_v63 = vor.u32 %v3632_v54, %v3192_v4  ;;  %v3610_v13 = vld [vmem:[%s4332_s3 + $0x14] sm:$0xf] }
  0xdb   :  { %v1363_v33 = vpop.f32.mrf.mxu2  ;;  %2037 = vmatpush.bf16.msra.mxu2 %v3271_v56 }
  0xdc   :  { %2014 = vmatpush.bf16.msra.mxu3 %v3119_v60  ;;  %v4002_v38 = vpack.c.bf16 %v1612_v24, %v1612_v24  ;;  %v1362_v60 = vadd.f32 %v1361_v12, %v1349_v27  ;;  %v3647_v24 = vld [vmem:[%s4332_s3 + $0x134] sm:$0xf0] }
  0xdd   :  { %v3643_v27 = vld [vmem:[%s4332_s3 + $0x114] sm:$0xf0] }
  0xde   :  { %2028 = vmatpush.bf16.msra.mxu1 %v3175_v8 }
  0xdf   :  { %2038 = vmatpush.bf16.msra.mxu2 %v3263_v0  ;;  %v3264_v0 = vld [vmem:[%s4332_s3 + $0x158] sm:$0xf0] }
  0xe0   :  { %2015 = vmatpush.bf16.msra.mxu3 %v3111_v1  ;;  %3091 = vmatmul.msk.bf16.vlgmr.msrb.gmra.mxu2 %vm1244_vm0, %v3823_v45  ;;  %v3152_v45 = vld [vmem:[%s4332_s3 + $0x78] sm:$0xf0]  ;;  %v3630_v1 = vld [vmem:[%s4332_s3 + $0xb4] sm:$0xf] }
  0xe1   :  { %v3155_v25 = vor.u32 %v3622_v17, %v3152_v45  ;;  %v3187_v8 = vor.u32 %v3630_v1, %v3184_v2  ;;  %v3179_v17 = vor.u32 %v3628_v10, %v3176_v11  ;;  %v3254_v45 = vld [vmem:[%s4332_s3 + $0x140] sm:$0xf]  ;;  %v3648_v2 = vld [vmem:[%s4332_s3 + $0x144] sm:$0xf]  ;;  %v3248_v10 = vld [vmem:[%s4332_s3 + $0x138] sm:$0xf0] }
  0xe2   :  { %2029 = vmatpush.bf16.msra.mxu1 %v3167_v18  ;;  %v3626_v18 = vld [vmem:[%s4332_s3 + $0x94] sm:$0xf]  ;;  %v3255_v22 = vor.u32 %v3649_v19, %v3254_v45  ;;  %v3669_v19 = vld [vmem:[%s4332_s3 + $0x1e4] sm:$0xf0] }
  0xe3   :  { %v3171_v33 = vor.u32 %v3626_v18, %v3168_v21  ;;  %v3334_v18 = vld [vmem:[%s4332_s3 + $0x1e0] sm:$0xf]  ;;  %v3642_v21 = vld [vmem:[%s4332_s3 + $0x114] sm:$0xf] }
  0xe4   :  { %2016 = vmatpush.bf16.msra.mxu3 %v3103_v55  ;;  %v3115_v55 = vor.u32 %v3612_v6, %v3112_v7  ;;  %2039 = vmatpush.bf16.msra.mxu2 %v3255_v22  ;;  %v3232_v22 = vld [vmem:[%s4332_s3 + $0x118] sm:$0xf0] }
  0xe5   :  { %v1374_v37 = vpop.f32.mrf.mxu0 }
  0xe6   :  { %2030 = vmatpush.bf16.msra.mxu1 %v3159_v28  ;;  %v1375_v3 = vadd.f32 %v1374_v37, %v1362_v60  ;;  %v3107_v28 = vor.u32 %v3610_v13, %v3104_v15  ;;  %v3283_v60 = vor.u32 %v3654_v58, %v3280_v59  ;;  %v3671_v13 = vld [vmem:[%s4332_s3 + $0x1f4] sm:$0xf0] }
  0xe8   :  { %2017 = vmatpush.bf16.msra.mxu3 %v3095_v23  ;;  %v1387_v9 = vpop.f32.mrf.mxu1  ;;  %v3246_v23 = vld [vmem:[%s4332_s3 + $0x130] sm:$0xf] }
  0xe9   :  { %v1388_v12 = vadd.f32 %v1387_v9, %v1375_v3  ;;  %v3247_v31 = vor.u32 %v3647_v24, %v3246_v23  ;;  %v3256_v3 = vld [vmem:[%s4332_s3 + $0x148] sm:$0xf0]  ;;  %v3646_v9 = vld [vmem:[%s4332_s3 + $0x134] sm:$0xf]  ;;  %v3326_v23 = vld [vmem:[%s4332_s3 + $0x1d0] sm:$0xf] }
  0xea   :  { %2075 = vmatpush.bf16.msrb.mxu1 %v3219_v32  ;;  %v3096_v32 = vld [vmem:[%s4332_s3 + $0x8] sm:$0xf0]  ;;  %v3259_v6 = vor.u32 %v3648_v2, %v3256_v3  ;;  %v3667_v24 = vld [vmem:[%s4332_s3 + $0x1d4] sm:$0xf0] }
  0xeb   :  { %2018 = vmatmul.bf16.vlgmr.msra.gmra.mxu3 %v4002_v38  ;;  %2040 = vmatpush.bf16.msra.mxu2 %v3247_v31  ;;  %v3327_v31 = vor.u32 %v3667_v24, %v3326_v23  ;;  %v3658_v24 = vld [vmem:[%s4332_s3 + $0x194] sm:$0xf] }
  0xec   :  { %2062 = vmatpush.bf16.msrb.mxu3 %v3155_v25 }
  0xed   :  { %v1376_v20 = vpop.f32.mrf.mxu0 }
  0xee   :  { %2076 = vmatpush.bf16.msrb.mxu1 %v3211_v41  ;;  %v1400_v16 = vpop.f32.mrf.mxu3  ;;  %v3099_v41 = vor.u32 %v3608_v29, %v3096_v32  ;;  %v3335_v20 = vor.u32 %v3669_v19, %v3334_v18  ;;  %v3235_v29 = vor.u32 %v3642_v21, %v3232_v22  ;;  %v3640_v32 = vld [vmem:[%s4332_s3 + $0x104] sm:$0xf]  ;;  %v3312_v18 = vld [vmem:[%s4332_s3 + $0x1b8] sm:$0xf0]  ;;  %v3304_v21 = vld [vmem:[%s4332_s3 + $0x1a8] sm:$0xf0] }
  0xef   :  { %v1401_v25 = vadd.f32 %v1400_v16, %v1388_v12  ;;  %2041 = vmatpush.bf16.msra.mxu2 %v3239_v42  ;;  %v3251_v12 = vor.u32 %v3646_v9, %v3248_v10  ;;  %v3644_v16 = vld [vmem:[%s4332_s3 + $0x124] sm:$0xf]  ;;  %v259_v22 = vperm.slane %v3868_v49, 3 }
  0xf0   :  { %2063 = vmatpush.bf16.msrb.mxu3 %v3147_v39  ;;  %v1389_v14 = vpop.f32.mrf.mxu1  ;;  %v3624_v39 = vld [vmem:[%s4332_s3 + $0x84] sm:$0xf] }
  0xf1   :  { %v3163_v57 = vor.u32 %v3624_v39, %v3160_v51  ;;  %v3318_v39 = vld [vmem:[%s4332_s3 + $0x1c0] sm:$0xf]  ;;  %v3665_v51 = vld [vmem:[%s4332_s3 + $0x1c4] sm:$0xf0] }
  0xf2   :  { %2077 = vmatpush.bf16.msrb.mxu1 %v3203_v53  ;;  %v3641_v53 = vld [vmem:[%s4332_s3 + $0x104] sm:$0xf0] }
  0xf3   :  { %v1413_v26 = vpop.f32.mrf.mxu2  ;;  %v3223_v56 = vor.u32 %v3641_v53, %v3222_v52 }
  0xf4   :  { %2064 = vmatpush.bf16.msrb.mxu3 %v3139_v48  ;;  %v1414_v40 = vadd.f32 %v1413_v26, %v1401_v25  ;;  %v3231_v48 = vor.u32 %v3643_v27, %v3230_v44  ;;  %v258_v25 = vperm.slane %v3868_v49, 2  ;;  %v3656_v49 = vld [vmem:[%s4332_s3 + $0x184] sm:$0xf] }
  0xf5   :  { %v1426_v46 = vpop.f32.mrf.mxu0 }
  0xf6   :  { %2078 = vmatpush.bf16.msrb.mxu1 %v3195_v63  ;;  %v1402_v43 = vpop.f32.mrf.mxu3  ;;  %v1427_v30 = vadd.f32 %v1426_v46, %v1414_v40  ;;  %2042 = vmatpush.bf16.msra.mxu2 %v3231_v48  ;;  %v3650_v63 = vld [vmem:[%s4332_s3 + $0x154] sm:$0xf] }
  0xf7   :  { %v3267_v1 = vor.u32 %v3650_v63, %v3264_v0  ;;  %v3663_v43 = vld [vmem:[%s4332_s3 + $0x1b4] sm:$0xf0] }
  0xf8   :  { %2065 = vmatpush.bf16.msrb.mxu3 %v3131_v61  ;;  %v1613_v50 = vmax.f32 %v1427_v30, 0.0  ;;  %v3652_v61 = vld [vmem:[%s4332_s3 + $0x164] sm:$0xf]  ;;  %v3302_v30 = vld [vmem:[%s4332_s3 + $0x1a0] sm:$0xf] }
  0xfa   :  { %2079 = vmatpush.bf16.msrb.mxu1 %v3187_v8  ;;  %v1617_v54 = vpack.c.bf16 %v1613_v50, %v1613_v50  ;;  %2043 = vmatpush.bf16.msra.mxu2 %v3223_v56  ;;  %v3659_v56 = vld [vmem:[%s4332_s3 + $0x194] sm:$0xf0] }
  0xfb   :  { %v1415_v47 = vpop.f32.mrf.mxu2 }
  0xfc   :  { %2066 = vmatpush.bf16.msrb.mxu3 %v3123_v5  ;;  %2031 = vmatmul.bf16.vlgmr.msra.gmra.mxu1 %v1617_v54  ;;  %v3661_v47 = vld [vmem:[%s4332_s3 + $0x1a4] sm:$0xf0] }
  0xfd   :  { %v1428_v4 = vpop.f32.mrf.mxu0  ;;  %v3303_v50 = vor.u32 %v3661_v47, %v3302_v30 }
  0xfe   :  { %2080 = vmatpush.bf16.msrb.mxu1 %v3179_v17  ;;  %2088 = vmatpush.bf16.msrb.mxu2 %v3283_v60  ;;  %v3240_v17 = vld [vmem:[%s4332_s3 + $0x128] sm:$0xf0] }
  0xff   :  { %v3243_v45 = vor.u32 %v3644_v16, %v3240_v17  ;;  %v3662_v17 = vld [vmem:[%s4332_s3 + $0x1b4] sm:$0xf] }
 0x100   :  { %2067 = vmatpush.bf16.msrb.mxu3 %v3115_v55  ;;  %v3342_v55 = vld [vmem:[%s4332_s3 + $0x1f0] sm:$0xf]  ;;  %v3315_v19 = vor.u32 %v3662_v17, %v3312_v18  ;;  %v3681_v17 = vld [vmem:[%s4334_s5 + $0x48] sm:$0xff] }
 0x101   :  { %v3343_v15 = vor.u32 %v3671_v13, %v3342_v55  ;;  %v3664_v13 = vld [vmem:[%s4332_s3 + $0x1c4] sm:$0xf] }
 0x102   :  { %2081 = vmatpush.bf16.msrb.mxu1 %v3171_v33  ;;  %v3224_v33 = vld [vmem:[%s4332_s3 + $0x108] sm:$0xf0] }
 0x103   :  { %2049 = vmatpush.bf16.msra.mxu0 %v3343_v15  ;;  %v3227_v14 = vor.u32 %v3640_v32, %v3224_v33  ;;  %v3320_v15 = vld [vmem:[%s4332_s3 + $0x1c8] sm:$0xf0] }
 0x104   :  { %2068 = vmatpush.bf16.msrb.mxu3 %v3107_v28  ;;  %v3323_v16 = vor.u32 %v3664_v13, %v3320_v15  ;;  %v3683_v13 = vld [vmem:[%s4334_s5 + $0x58] sm:$0xff] }
 0x106   :  { %2082 = vmatpush.bf16.msrb.mxu1 %v3163_v57  ;;  %v1439_v35 = vpop.f32.mrf.mxu1  ;;  %v3310_v57 = vld [vmem:[%s4332_s3 + $0x1b0] sm:$0xf] }
 0x107   :  { %2050 = vmatpush.bf16.msra.mxu0 %v3335_v20  ;;  %v1440_v36 = vadd.f32 %v1439_v35, %v258_v25  ;;  %v3311_v46 = vor.u32 %v3663_v43, %v3310_v57  ;;  %v3660_v20 = vld [vmem:[%s4332_s3 + $0x1a4] sm:$0xf]  ;;  %v3296_v25 = vld [vmem:[%s4332_s3 + $0x198] sm:$0xf0] }
 0x108   :  { %2069 = vmatpush.bf16.msrb.mxu3 %v3099_v41  ;;  %v3319_v41 = vor.u32 %v3665_v51, %v3318_v39  ;;  %v3307_v23 = vor.u32 %v3660_v20, %v3304_v21 }
 0x10a   :  { %v1465_v37 = vpop.f32.mrf.mxu0 }
 0x10b   :  { %2070 = vmatmul.bf16.vlgmr.msrb.gmra.mxu3 %v4002_v38  ;;  %v3272_v38 = vld [vmem:[%s4332_s3 + $0x168] sm:$0xf0]  ;;  %2051 = vmatpush.bf16.msra.mxu0 %v3327_v31 }
 0x10c   :  { %v3275_v62 = vor.u32 %v3652_v61, %v3272_v38  ;;  %2083 = vmatmul.bf16.vlgmr.msrb.gmra.mxu1 %v1617_v54  ;;  %v3294_v54 = vld [vmem:[%s4332_s3 + $0x190] sm:$0xf]  ;;  %v3286_v38 = vld [vmem:[%s4332_s3 + $0x180] sm:$0xf] }
 0x10d   :  { %v3295_v59 = vor.u32 %v3659_v56, %v3294_v54 }
 0x10e   :  { %2089 = vmatpush.bf16.msrb.mxu2 %v3275_v62  ;;  %v1441_v5 = vpop.f32.mrf.mxu1  ;;  %v1452_v8 = vpop.f32.mrf.mxu3  ;;  %v3657_v62 = vld [vmem:[%s4332_s3 + $0x184] sm:$0xf0] }
 0x10f   :  { %v1453_v40 = vadd.f32 %v1452_v8, %v1440_v36  ;;  %2052 = vmatpush.bf16.msra.mxu0 %v3319_v41  ;;  %v3287_v63 = vor.u32 %v3657_v62, %v3286_v38  ;;  %v3668_v5 = vld [vmem:[%s4332_s3 + $0x1e4] sm:$0xf] }
 0x111   :  { %v1466_v44 = vadd.f32 %v1465_v37, %v1453_v40  ;;  %v3670_v37 = vld [vmem:[%s4332_s3 + $0x1f4] sm:$0xf] }
 0x112   :  { %2090 = vmatpush.bf16.msrb.mxu2 %v3267_v1  ;;  %v1467_v11 = vpop.f32.mrf.mxu0  ;;  %v3344_v1 = vld [vmem:[%s4332_s3 + $0x1f8] sm:$0xf0] }
 0x113   :  { %v1478_v7 = vpop.f32.mrf.mxu2  ;;  %2053 = vmatpush.bf16.msra.mxu0 %v3311_v46  ;;  %v3347_v2 = vor.u32 %v3670_v37, %v3344_v1  ;;  %v3666_v11 = vld [vmem:[%s4332_s3 + $0x1d4] sm:$0xf]  ;;  %v3677_v1 = vld [vmem:[%s4334_s5 + $0x28] sm:$0xff] }
 0x114   :  { %v1479_v48 = vadd.f32 %v1478_v7, %v1466_v44  ;;  %v3678_v37 = vld [vmem:[%s4334_s5 + $0x30] sm:$0xff] }
 0x116   :  { %2091 = vmatpush.bf16.msrb.mxu2 %v3259_v6  ;;  %v1454_v28 = vpop.f32.mrf.mxu3  ;;  %v3336_v6 = vld [vmem:[%s4332_s3 + $0x1e8] sm:$0xf0] }
 0x117   :  { %2054 = vmatpush.bf16.msra.mxu0 %v3303_v50  ;;  %v3339_v8 = vor.u32 %v3668_v5, %v3336_v6  ;;  %v3686_v5 = vld [vmem:[%s4334_s5 + $0x70] sm:$0xff]  ;;  %v3675_v6 = vld [vmem:[%s4334_s5 + $0x18] sm:$0xff] }
 0x11a   :  { %2092 = vmatpush.bf16.msrb.mxu2 %v3251_v12  ;;  %v1517_v34 = vpop.f32.mrf.mxu0  ;;  %v3328_v12 = vld [vmem:[%s4332_s3 + $0x1d8] sm:$0xf0] }
 0x11b   :  { %v1480_v26 = vpop.f32.mrf.mxu2  ;;  %2055 = vmatpush.bf16.msra.mxu0 %v3295_v59  ;;  %v3331_v55 = vor.u32 %v3666_v11, %v3328_v12  ;;  %v3672_v12 = vld [vmem:[%s4334_s5] sm:$0xff] }
 0x11c   :  { %v3299_v26 = vor.u32 %v3658_v24, %v3296_v25 }
 0x11e   :  { %2093 = vmatpush.bf16.msrb.mxu2 %v3243_v45 }
 0x11f   :  { %2056 = vmatpush.bf16.msra.mxu0 %v3287_v63 }
 0x122   :  { %2094 = vmatpush.bf16.msrb.mxu2 %v3235_v29  ;;  %v1519_v42 = vpop.f32.mrf.mxu0 }
 0x123   :  { %2101 = vmatpush.bf16.msrb.mxu0 %v3347_v2  ;;  %v3676_v2 = vld [vmem:[%s4334_s5 + $0x20] sm:$0xff] }
 0x126   :  { %2095 = vmatpush.bf16.msrb.mxu2 %v3227_v14  ;;  %v1491_v27 = vpop.f32.mrf.mxu1 }
 0x127   :  { %v1492_v52 = vadd.f32 %v1491_v27, %v1479_v48  ;;  %2102 = vmatpush.bf16.msrb.mxu0 %v3339_v8  ;;  %v3674_v8 = vld [vmem:[%s4334_s5 + $0x10] sm:$0xff] }
 0x12b   :  { %2103 = vmatpush.bf16.msrb.mxu0 %v3331_v55  ;;  %v3684_v55 = vld [vmem:[%s4334_s5 + $0x60] sm:$0xff] }
 0x12e   :  { %v1504_v53 = vpop.f32.mrf.mxu3  ;;  %v1493_v58 = vpop.f32.mrf.mxu1 }
 0x12f   :  { %v1505_v4 = vadd.f32 %v1504_v53, %v1492_v52  ;;  %v1543_v61 = vpop.f32.mrf.mxu0  ;;  %2104 = vmatpush.bf16.msrb.mxu0 %v3323_v16  ;;  %v1684_v52 = vld [vmem:[%s4333_s4] sm:$0x3]  ;;  %v3682_v16 = vld [vmem:[%s4334_s5 + $0x50] sm:$0xff] }
 0x130   :  { %v1686_v53 = vperm.slane %v1684_v52, 0 }
 0x131   :  { %v1518_v35 = vadd.f32 %v1517_v34, %v1505_v4  ;;  %v3288_v34 = vld [vmem:[%s4332_s3 + $0x188] sm:$0xf0] }
 0x132   :  { %v3291_v14 = vor.u32 %v3656_v49, %v3288_v34  ;;  %v3692_v49 = vld [vmem:[%s4335_s6] ss:$0 sm:$0xff]  ;;  %s2294_s6 = sshll.u32 %s4336_s7, 4  ;;  %s2295_s6 = int_to_ptr.hbm [resolvable:$true] %s2294_s6 }
 0x133   :  { %v1530_v60 = vpop.f32.mrf.mxu2  ;;  %v1614_v0 = vmax.f32 %v1518_v35, 0.0  ;;  %2105 = vmatpush.bf16.msrb.mxu0 %v3315_v19 }
 0x134   :  { %v1531_v29 = vadd.f32 %v1530_v60, %v259_v22  ;;  %v1687_v60 = vperm.slane %v1684_v52, 1 }
 0x135   :  { %v1618_v3 = vpack.c.bf16 %v1614_v0, %v1614_v0  ;;  %v3679_v0 = vld [vmem:[%s4334_s5 + $0x38] sm:$0xff] }
 0x136   :  { %v1506_v7 = vpop.f32.mrf.mxu3  ;;  %v1544_v36 = vadd.f32 %v1543_v61, %v1531_v29  ;;  %2250 = vmatpush.bf16.msra.mxu3 %v3679_v0 }
 0x137   :  { %2044 = vmatmul.bf16.vlgmr.msra.gmra.mxu2 %v1618_v3  ;;  %v1545_v10 = vpop.f32.mrf.mxu0  ;;  %2106 = vmatpush.bf16.msrb.mxu0 %v3307_v23 }
 0x138   :  { %v3685_v10 = vld [vmem:[%s4334_s5 + $0x68] sm:$0xff] }
 0x13a   :  { %2251 = vmatpush.bf16.msra.mxu3 %v3678_v37 }
 0x13b   :  { %v1532_v9 = vpop.f32.mrf.mxu2  ;;  %2107 = vmatpush.bf16.msrb.mxu0 %v3299_v26 }
 0x13c   :  { %v3673_v9 = vld [vmem:[%s4334_s5 + $0x8] sm:$0xff] }
 0x13e   :  { %2252 = vmatpush.bf16.msra.mxu3 %v3677_v1 }
 0x13f   :  { %2108 = vmatpush.bf16.msrb.mxu0 %v3291_v14 }
 0x142   :  { %2253 = vmatpush.bf16.msra.mxu3 %v3676_v2 }
 0x146   :  { %v1556_v45 = vpop.f32.mrf.mxu1  ;;  %2254 = vmatpush.bf16.msra.mxu3 %v3675_v6 }
 0x147   :  { %2096 = vmatmul.bf16.vlgmr.msrb.gmra.mxu2 %v1618_v3  ;;  %v1557_v39 = vadd.f32 %v1556_v45, %v1544_v36  ;;  %v3687_v3 = vld [vmem:[%s4334_s5 + $0x78] sm:$0xff]  ;;  %v3680_v45 = vld [vmem:[%s4334_s5 + $0x40] sm:$0xff]  ;;  %s3752_s5 = smov [#allocation5]  }
 0x148   :  { %2263 = vmatpush.bf16.msra.mxu1 %v3687_v3  ;;  %s2292_s2 = sshll.u32 %s3752_s5, 4  ;;  %s2293_s2 = int_to_ptr.vmem [resolvable:$true] %s2292_s2 }
 0x14a   :  { %2255 = vmatpush.bf16.msra.mxu3 %v3674_v8 }
 0x14c   :  { %2264 = vmatpush.bf16.msra.mxu1 %v3686_v5 }
 0x14e   :  { %v1569_v28 = vpop.f32.mrf.mxu3  ;;  %v1558_v31 = vpop.f32.mrf.mxu1  ;;  %2256 = vmatpush.bf16.msra.mxu3 %v3673_v9 }
 0x14f   :  { %v1595_v33 = vpop.f32.mrf.mxu0  ;;  %v1570_v40 = vadd.f32 %v1569_v28, %v1557_v39 }
 0x150   :  { %2265 = vmatpush.bf16.msra.mxu1 %v3685_v10 }
 0x152   :  { %2257 = vmatpush.bf16.msra.mxu3 %v3672_v12 }
 0x153   :  { %v1582_v32 = vpop.f32.mrf.mxu2 }
 0x154   :  { %v1583_v57 = vadd.f32 %v1582_v32, %v1570_v40  ;;  %2266 = vmatpush.bf16.msra.mxu1 %v3684_v55 }
 0x156   :  { %v1571_v51 = vpop.f32.mrf.mxu3  ;;  %v1596_v43 = vadd.f32 %v1595_v33, %v1583_v57 }
 0x157   :  { %v1597_v42 = vpop.f32.mrf.mxu0 }
 0x158   :  { %2267 = vmatpush.bf16.msra.mxu1 %v3683_v13 }
 0x15b   :  { %v1584_v41 = vpop.f32.mrf.mxu2 }
 0x15c   :  { %2268 = vmatpush.bf16.msra.mxu1 %v3682_v16 }
 0x160   :  { %2269 = vmatpush.bf16.msra.mxu1 %v3681_v17 }
 0x163   :  { %v1608_v44 = vpop.f32.mrf.mxu2 }
 0x164   :  { %v1609_v27 = vadd.f32 %v1608_v44, %v1596_v43  ;;  %2270 = vmatpush.bf16.msra.mxu1 %v3680_v45 }
 0x166   :  { %v1615_v46 = vmax.f32 %v1609_v27, 0.0 }
 0x168   :  { %v1619_v30 = vpack.c.bf16 %v1615_v46, %v1615_v46 }
 0x16a   :  { %2057 = vmatmul.bf16.vlgmr.msra.gmra.mxu0 %v1619_v30 }
 0x16b   :  { %v1610_v47 = vpop.f32.mrf.mxu2 }
 0x16e   :  { %v2019_v48 = vpop.f32.mrf.mxu3 }
 0x16f   :  { %v2020_v54 = vadd.f32 %v2019_v48, %v1686_v53 }
 0x176   :  { %v2021_v50 = vpop.f32.mrf.mxu3 }
 0x179   :  { %v2032_v56 = vpop.f32.mrf.mxu1 }
 0x17a   :  { %2109 = vmatmul.bf16.vlgmr.msrb.gmra.mxu0 %v1619_v30  ;;  %v2033_v4 = vadd.f32 %v2032_v56, %v2020_v54 }
 0x181   :  { %v2034_v59 = vpop.f32.mrf.mxu1 }
 0x189   :  { %v2084_v62 = vpop.f32.mrf.mxu1 }
 0x18e   :  { %v2071_v58 = vpop.f32.mrf.mxu3 }
 0x18f   :  { %v2072_v38 = vadd.f32 %v2071_v58, %v1687_v60 }
 0x191   :  { %v2085_v35 = vadd.f32 %v2084_v62, %v2072_v38  ;;  %v2086_v63 = vpop.f32.mrf.mxu1 }
 0x196   :  { %v2073_v61 = vpop.f32.mrf.mxu3 }
 0x1ba   :  { %v2045_v7 = vpop.f32.mrf.mxu2 }
 0x1bb   :  { %v2046_v19 = vadd.f32 %v2045_v7, %v2033_v4 }
 0x1c2   :  { %v2047_v11 = vpop.f32.mrf.mxu2 }
 0x1ca   :  { %v2097_v15 = vpop.f32.mrf.mxu2 }
 0x1cb   :  { %v2098_v25 = vadd.f32 %v2097_v15, %v2085_v35 }
 0x1d2   :  { %v2099_v18 = vpop.f32.mrf.mxu2 }
 0x1e7   :  { %v2058_v20 = vpop.f32.mrf.mxu0 }
 0x1e8   :  { %v2059_v21 = vadd.f32 %v2058_v20, %v2046_v19 }
 0x1ea   :  { %v2114_v22 = vmax.f32 %v2059_v21, 0.0 }
 0x1ec   :  { %v2116_v23 = vpack.c.bf16 %v2114_v22, %v2114_v22 }
 0x1ee   :  { %2258 = vmatmul.bf16.vlgmr.msra.gmra.mxu3 %v2116_v23 }
 0x1ef   :  { %v2060_v24 = vpop.f32.mrf.mxu0 }
 0x1f7   :  { %v2110_v26 = vpop.f32.mrf.mxu0 }
 0x1f8   :  { %v2111_v28 = vadd.f32 %v2110_v26, %v2098_v25 }
 0x1fa   :  { %v2115_v29 = vmax.f32 %v2111_v28, 0.0 }
 0x1fc   :  { %v2117_v31 = vpack.c.bf16 %v2115_v29, %v2115_v29 }
 0x1fe   :  { %2271 = vmatmul.bf16.vlgmr.msra.gmra.mxu1 %v2117_v31 }
 0x1ff   :  { %v2112_v32 = vpop.f32.mrf.mxu0 }
 0x271   :  { %v2259_v33 = vpop.f32.mrf.mxu3 }
 0x272   :  { %v2260_v36 = vadd.f32 %v3692_v49, %v2259_v33 }
 0x279   :  { %v2261_v34 = vpop.f32.mrf.mxu3 }
 0x27b   :  { %v2272_v14 = vpop.f32.mrf.mxu1 }
 0x27c   :  { %v2273_v39 = vadd.f32 %v2272_v14, %v2260_v36 }
 0x27e   :  { %2276 = vmax.xlane.f32.xlu0 %v2273_v39 }
 0x283   :  { %v2274_v51 = vpop.f32.mrf.mxu1 }
 0x2f1   :  { %v2277_v40 = vpop.xlane.xlu0 %2276 }
 0x2f2   :  { %v2278_v41 = vsub.f32 %v2273_v39, %v2277_v40 }
 0x2f4   :  { %v2279_v42 = vmul.f32 1.442695, %v2278_v41 }
 0x2f6   :  { %3693 = vpow2.f32 %v2279_v42 }
 0x2fc   :  { %v3694_v57 = vpop.eup %3693 }
 0x2fd   :  { %2281 = vadd.xlane.f32.xlu0 %v3694_v57 }
 0x370   :  { %v2282_v43 = vpop.xlane.xlu0 %2281 }
 0x371   :  { %3695 = vlog2.f32 %v2282_v43 }
 0x377   :  { %v3696_v44 = vpop.eup %3695 }
 0x378   :  { %v2284_v27 = vmul.f32 0.6931472, %v3696_v44 }
 0x37a   :  { %v2285_v46 = vsub.f32 %v2278_v41, %v2284_v27 }
 0x37c   :  { %2286 = vst [vmem:[#allocation5] sm:$0xff] %v2285_v46 }
 0x37d   :  { %2297 = dma.vmem_to_hbm [thread:$0]  %s2293_s2, 128, %s2295_s6, [#allocation4]  }
 0x37e   :  { %3747 = dma.done.wait [#allocation4], 128  }
 0x37f   :  { %3748 = vsyncadd [#allocation4], 4294967168 }
 0x380   :  { %2302 = vsyncpa [#allocation3], 1 }
 0x381   :  { %2303 = vsyncpa [#allocation4], 1 }

</bundles_post_ra>
